<compile_context>
chip_gen: v5e
topology: v5e:2x2
jax: 0.10.0
libtpu: 0.0.40
codegen_flags: <defaults>
</compile_context>

<pallas_src>
import jax
import jax.numpy as jnp
from jax.experimental import pallas as pl
from jax.experimental.pallas import tpu as pltpu

NEG_BIG = -1e30  # padded-vocab bias: exp(NEG_BIG - max) == 0.0, softmax stays exact (f32).


def rnn_kernel(ids_ref, emb_ref, wih_ref, whh_ref, bpro_ref, bhn_ref,
               wlin_ref, blin_ref, out_ref):
    L = out_ref.shape[0]
    V, E = emb_ref.shape
    Hp = whh_ref.shape[0]          # padded (lane-aligned) hidden width, multiple of 128

    # --- Embedding gather: ids are scalars in SMEM, rows are dynamic VMEM loads.
    rows = []
    for t in range(L):
        idx = jnp.clip(ids_ref[t], 0, V - 1)            # clamp untrusted ids (OOB safety)
        rows.append(emb_ref[pl.ds(idx, 1), :])          # (1, E)
    embeds = jnp.concatenate(rows, axis=0)              # (L, E)

    # --- Prologue: input projections for ALL timesteps and gates in ONE dot.
    #     Gate blocks sit at lane offsets 0 / Hp / 2*Hp (128-aligned).
    #     b_ih (all gates) and b_hh (r,z gates) are pre-folded into bpro.
    xg = (jnp.dot(embeds, wih_ref[...], preferred_element_type=jnp.float32)
          + bpro_ref[...])                               # (L, 3*Hp)

    whh = whh_ref[...]                                   # (Hp, 3*Hp), packed
    bhn = bhn_ref[...]                                   # (1, Hp), b_hn only

    # --- GRU recurrence, fully unrolled; h and collected states stay in vregs.
    #     Per step: ONE MXU push for all three gates, lane-aligned slices.
    h = jnp.zeros((1, Hp), jnp.float32)
    hs = []
    for t in range(L):
        hg = jnp.dot(h, whh, preferred_element_type=jnp.float32)        # (1, 3*Hp)
        r = jax.nn.sigmoid(xg[t:t + 1, 0:Hp] + hg[:, 0:Hp])
        z = jax.nn.sigmoid(xg[t:t + 1, Hp:2 * Hp] + hg[:, Hp:2 * Hp])
        n = jnp.tanh(xg[t:t + 1, 2 * Hp:3 * Hp] + r * (hg[:, 2 * Hp:3 * Hp] + bhn))
        h = (1.0 - z) * n + z * h
        hs.append(h)
    hs = jnp.concatenate(hs, axis=0)                     # (L, Hp); pad lanes are 0

    # --- Dropout(eval) == identity; Linear + LogSoftmax over the padded vocab.
    #     Padded columns: weight 0, bias NEG_BIG -> exp underflows to exactly 0,
    #     so the log-softmax over the real V columns is unchanged.
    logits = (jnp.dot(hs, wlin_ref[...], preferred_element_type=jnp.float32)
              + blin_ref[...])                           # (L, Vp)
    m = jnp.max(logits, axis=1, keepdims=True)
    shifted = logits - m
    lse = jnp.log(jnp.sum(jnp.exp(shifted), axis=1, keepdims=True))
    out_ref[...] = shifted - lse                         # lane-dense full store


def rnn_forward(ids, emb, w_ih, w_hh, b_ih, b_hh, w_lin, b_lin):
    """ids: (L,) int32.  Returns (L, V) float32 log-probs (matches PyTorch forward)."""
    L = ids.shape[0]
    V, E = emb.shape
    H = w_hh.shape[1]
    Hp = ((H + 127) // 128) * 128            # lane-aligned per-gate block width
    Vp = ((V + 127) // 128) * 128            # lane-dense (padded) output width

    ids_i32 = ids.astype(jnp.int32)                                  # (L,)  -> SMEM

    # PyTorch GRU layout: rows of w_ih / w_hh are [r; z; n] gates; preact = x @ W^T.
    wih3 = w_ih.reshape(3, H, E).transpose(0, 2, 1)                  # (3, E, H)
    whh3 = w_hh.reshape(3, H, H).transpose(0, 2, 1)                  # (3, H, H)
    bih3 = b_ih.reshape(3, H)
    bhh3 = b_hh.reshape(3, H)

    # Pack gates at 128-lane-aligned column offsets; zero-pad real H -> Hp.
    wih_packed = jnp.concatenate(
        [jnp.pad(wih3[g], ((0, 0), (0, Hp - H))) for g in range(3)], axis=1)      # (E, 3*Hp)
    whh_packed = jnp.concatenate(
        [jnp.pad(whh3[g], ((0, Hp - H), (0, Hp - H))) for g in range(3)], axis=1)  # (Hp, 3*Hp)

    # Fold b_hr / b_hz into the prologue bias (r,z preacts are purely additive);
    # b_hn must stay per-step because it sits inside r * (W_hn h + b_hn).
    bpro = jnp.concatenate([
        jnp.pad(bih3[0] + bhh3[0], (0, Hp - H)),
        jnp.pad(bih3[1] + bhh3[1], (0, Hp - H)),
        jnp.pad(bih3[2], (0, Hp - H)),
    ]).reshape(1, 3 * Hp)                                            # (1, 3*Hp)
    bhn = jnp.pad(bhh3[2], (0, Hp - H)).reshape(1, Hp)               # (1, Hp)

    # Output Linear: pad hidden rows (zeros) and vocab columns (zero weight,
    # NEG_BIG bias). Keep f32: bf16 would need the pad columns kept exactly 0.
    wlin_p = jnp.pad(w_lin.T, ((0, Hp - H), (0, Vp - V)))            # (Hp, Vp)
    blin_p = jnp.pad(b_lin, (0, Vp - V),
                     constant_values=NEG_BIG).reshape(1, Vp)         # (1, Vp)

    smem = pl.BlockSpec(memory_space=pltpu.MemorySpace.SMEM)
    vmem = pl.BlockSpec(memory_space=pltpu.MemorySpace.VMEM)
    out_p = pl.pallas_call(
        rnn_kernel,
        out_shape=jax.ShapeDtypeStruct((L, Vp), jnp.float32),
        in_specs=[smem] + [vmem] * 7,
        out_specs=vmem,
    )(ids_i32, emb, wih_packed, whh_packed, bpro, bhn, wlin_p, blin_p)
    return out_p[:, :V]


def rnn_reference(ids, emb, w_ih, w_hh, b_ih, b_hh, w_lin, b_lin):
    """Pure-JAX reference replicating torch.nn.GRU + Linear + LogSoftmax."""
    H = w_hh.shape[1]
    embeds = emb[ids]                                    # (L, E)

    def step(h, x):
        xg = x @ w_ih.T + b_ih
        hg = h @ w_hh.T + b_hh
        xr, xz, xn = xg[:H], xg[H:2 * H], xg[2 * H:]
        hr, hz, hn = hg[:H], hg[H:2 * H], hg[2 * H:]
        r = jax.nn.sigmoid(xr + hr)
        z = jax.nn.sigmoid(xz + hz)
        n = jnp.tanh(xn + r * hn)
        h_new = (1.0 - z) * n + z * h
        return h_new, h_new

    _, hs = jax.lax.scan(step, jnp.zeros((H,), jnp.float32), embeds)
    logits = hs @ w_lin.T + b_lin
    return jax.nn.log_softmax(logits, axis=1)


if __name__ == "__main__":
    # Small shapes consistent with the module: vocab=16, embed=32, hidden=32, seq=8.
    num_embeddings, embedding_dim, hidden_dim, seq_len = 16, 32, 32, 8

    key = jax.random.PRNGKey(0)
    ks = jax.random.split(key, 9)
    s_gru = 1.0 / jnp.sqrt(hidden_dim)
    s_lin = 1.0 / jnp.sqrt(hidden_dim)

    emb = jax.random.normal(ks[0], (num_embeddings, embedding_dim), jnp.float32)
    w_ih = jax.random.uniform(ks[1], (3 * hidden_dim, embedding_dim), jnp.float32, -s_gru, s_gru)
    w_hh = jax.random.uniform(ks[2], (3 * hidden_dim, hidden_dim), jnp.float32, -s_gru, s_gru)
    b_ih = jax.random.uniform(ks[3], (3 * hidden_dim,), jnp.float32, -s_gru, s_gru)
    b_hh = jax.random.uniform(ks[4], (3 * hidden_dim,), jnp.float32, -s_gru, s_gru)
    w_lin = jax.random.uniform(ks[5], (num_embeddings, hidden_dim), jnp.float32, -s_lin, s_lin)
    b_lin = jax.random.uniform(ks[6], (num_embeddings,), jnp.float32, -s_lin, s_lin)

    ids = jax.random.randint(ks[7], (seq_len,), 0, num_embeddings, jnp.int32)

    out = rnn_forward(ids, emb, w_ih, w_hh, b_ih, b_hh, w_lin, b_lin)
    out = jax.block_until_ready(out)

    ref = rnn_reference(ids, emb, w_ih, w_hh, b_ih, b_hh, w_lin, b_lin)
    assert out.shape == (seq_len, num_embeddings)
    assert jnp.allclose(out, ref, atol=1e-4, rtol=1e-4), "mismatch vs JAX reference"

    print("KERNEL_OK")
</pallas_src>

<mosaic_0001>
module attributes {stable_mosaic.version = 11 : i64} {
  func.func @rnn_kernel(%arg0: memref<8xi32, #tpu.memory_space<smem>>, %arg1: memref<16x32xf32, #tpu.memory_space<vmem>>, %arg2: memref<32x384xf32, #tpu.memory_space<vmem>>, %arg3: memref<128x384xf32, #tpu.memory_space<vmem>>, %arg4: memref<1x384xf32, #tpu.memory_space<vmem>>, %arg5: memref<1x128xf32, #tpu.memory_space<vmem>>, %arg6: memref<128x128xf32, #tpu.memory_space<vmem>>, %arg7: memref<1x128xf32, #tpu.memory_space<vmem>>, %arg8: memref<8x128xf32, #tpu.memory_space<vmem>>) attributes {dimension_semantics = [], scalar_prefetch = 0 : i64, scratch_operands = 0 : i64, tpu.core_type = #tpu.core_type<tc>} {
    %c0 = arith.constant 0 : index
    %0 = memref.load %arg0[%c0] : memref<8xi32, #tpu.memory_space<smem>>
    %c0_i32 = arith.constant 0 : i32
    %c15_i32 = arith.constant 15 : i32
    %1 = arith.maxsi %c0_i32, %0 : i32
    %2 = arith.minsi %c15_i32, %1 : i32
    %3 = arith.index_cast %2 : i32 to index
    %c0_0 = arith.constant 0 : index
    %4 = vector.load %arg1[%3, %c0_0] : memref<16x32xf32, #tpu.memory_space<vmem>>, vector<1x32xf32>
    %c1 = arith.constant 1 : index
    %5 = memref.load %arg0[%c1] : memref<8xi32, #tpu.memory_space<smem>>
    %c0_i32_1 = arith.constant 0 : i32
    %c15_i32_2 = arith.constant 15 : i32
    %6 = arith.maxsi %c0_i32_1, %5 : i32
    %7 = arith.minsi %c15_i32_2, %6 : i32
    %8 = arith.index_cast %7 : i32 to index
    %c0_3 = arith.constant 0 : index
    %9 = vector.load %arg1[%8, %c0_3] : memref<16x32xf32, #tpu.memory_space<vmem>>, vector<1x32xf32>
    %c2 = arith.constant 2 : index
    %10 = memref.load %arg0[%c2] : memref<8xi32, #tpu.memory_space<smem>>
    %c0_i32_4 = arith.constant 0 : i32
    %c15_i32_5 = arith.constant 15 : i32
    %11 = arith.maxsi %c0_i32_4, %10 : i32
    %12 = arith.minsi %c15_i32_5, %11 : i32
    %13 = arith.index_cast %12 : i32 to index
    %c0_6 = arith.constant 0 : index
    %14 = vector.load %arg1[%13, %c0_6] : memref<16x32xf32, #tpu.memory_space<vmem>>, vector<1x32xf32>
    %c3 = arith.constant 3 : index
    %15 = memref.load %arg0[%c3] : memref<8xi32, #tpu.memory_space<smem>>
    %c0_i32_7 = arith.constant 0 : i32
    %c15_i32_8 = arith.constant 15 : i32
    %16 = arith.maxsi %c0_i32_7, %15 : i32
    %17 = arith.minsi %c15_i32_8, %16 : i32
    %18 = arith.index_cast %17 : i32 to index
    %c0_9 = arith.constant 0 : index
    %19 = vector.load %arg1[%18, %c0_9] : memref<16x32xf32, #tpu.memory_space<vmem>>, vector<1x32xf32>
    %c4 = arith.constant 4 : index
    %20 = memref.load %arg0[%c4] : memref<8xi32, #tpu.memory_space<smem>>
    %c0_i32_10 = arith.constant 0 : i32
    %c15_i32_11 = arith.constant 15 : i32
    %21 = arith.maxsi %c0_i32_10, %20 : i32
    %22 = arith.minsi %c15_i32_11, %21 : i32
    %23 = arith.index_cast %22 : i32 to index
    %c0_12 = arith.constant 0 : index
    %24 = vector.load %arg1[%23, %c0_12] : memref<16x32xf32, #tpu.memory_space<vmem>>, vector<1x32xf32>
    %c5 = arith.constant 5 : index
    %25 = memref.load %arg0[%c5] : memref<8xi32, #tpu.memory_space<smem>>
    %c0_i32_13 = arith.constant 0 : i32
    %c15_i32_14 = arith.constant 15 : i32
    %26 = arith.maxsi %c0_i32_13, %25 : i32
    %27 = arith.minsi %c15_i32_14, %26 : i32
    %28 = arith.index_cast %27 : i32 to index
    %c0_15 = arith.constant 0 : index
    %29 = vector.load %arg1[%28, %c0_15] : memref<16x32xf32, #tpu.memory_space<vmem>>, vector<1x32xf32>
    %c6 = arith.constant 6 : index
    %30 = memref.load %arg0[%c6] : memref<8xi32, #tpu.memory_space<smem>>
    %c0_i32_16 = arith.constant 0 : i32
    %c15_i32_17 = arith.constant 15 : i32
    %31 = arith.maxsi %c0_i32_16, %30 : i32
    %32 = arith.minsi %c15_i32_17, %31 : i32
    %33 = arith.index_cast %32 : i32 to index
    %c0_18 = arith.constant 0 : index
    %34 = vector.load %arg1[%33, %c0_18] : memref<16x32xf32, #tpu.memory_space<vmem>>, vector<1x32xf32>
    %c7 = arith.constant 7 : index
    %35 = memref.load %arg0[%c7] : memref<8xi32, #tpu.memory_space<smem>>
    %c0_i32_19 = arith.constant 0 : i32
    %c15_i32_20 = arith.constant 15 : i32
    %36 = arith.maxsi %c0_i32_19, %35 : i32
    %37 = arith.minsi %c15_i32_20, %36 : i32
    %38 = arith.index_cast %37 : i32 to index
    %c0_21 = arith.constant 0 : index
    %39 = vector.load %arg1[%38, %c0_21] : memref<16x32xf32, #tpu.memory_space<vmem>>, vector<1x32xf32>
    %40 = tpu.concatenate %4, %9, %14, %19, %24, %29, %34, %39 in 0 : vector<1x32xf32>, vector<1x32xf32>, vector<1x32xf32>, vector<1x32xf32>, vector<1x32xf32>, vector<1x32xf32>, vector<1x32xf32>, vector<1x32xf32> -> vector<8x32xf32>
    %c0_22 = arith.constant 0 : index
    %c0_23 = arith.constant 0 : index
    %41 = vector.load %arg2[%c0_22, %c0_23] : memref<32x384xf32, #tpu.memory_space<vmem>>, vector<32x384xf32>
    %cst = arith.constant dense<0.000000e+00> : vector<8x384xf32>
    %42 = tpu.matmul %40, %41, %cst {dimension_numbers = #tpu.dot_dimension_numbers<[1], [0], [0], [1], [0, 0, 1, 1], [], []>} : vector<8x32xf32>, vector<32x384xf32>, vector<8x384xf32> -> vector<8x384xf32>
    %c0_24 = arith.constant 0 : index
    %c0_25 = arith.constant 0 : index
    %43 = vector.load %arg4[%c0_24, %c0_25] : memref<1x384xf32, #tpu.memory_space<vmem>>, vector<1x384xf32>
    %44 = vector.broadcast %43 : vector<1x384xf32> to vector<8x384xf32>
    %45 = arith.addf %42, %44 : vector<8x384xf32>
    %c0_26 = arith.constant 0 : index
    %c0_27 = arith.constant 0 : index
    %46 = vector.load %arg3[%c0_26, %c0_27] : memref<128x384xf32, #tpu.memory_space<vmem>>, vector<128x384xf32>
    %c0_28 = arith.constant 0 : index
    %c0_29 = arith.constant 0 : index
    %47 = vector.load %arg5[%c0_28, %c0_29] : memref<1x128xf32, #tpu.memory_space<vmem>>, vector<1x128xf32>
    %cst_30 = arith.constant 0.000000e+00 : f32
    %48 = vector.broadcast %cst_30 : f32 to vector<1x128xf32>
    %cst_31 = arith.constant dense<0.000000e+00> : vector<1x384xf32>
    %49 = tpu.matmul %48, %46, %cst_31 {dimension_numbers = #tpu.dot_dimension_numbers<[1], [0], [0], [1], [0, 0, 1, 1], [], []>} : vector<1x128xf32>, vector<128x384xf32>, vector<1x384xf32> -> vector<1x384xf32>
    %50 = vector.extract_strided_slice %45 {offsets = [0, 0], sizes = [1, 128], strides = [1, 1]} : vector<8x384xf32> to vector<1x128xf32>
    %51 = vector.extract_strided_slice %49 {offsets = [0, 0], sizes = [1, 128], strides = [1, 1]} : vector<1x384xf32> to vector<1x128xf32>
    %52 = arith.addf %50, %51 : vector<1x128xf32>
    %53 = arith.negf %52 : vector<1x128xf32>
    %54 = math.exp %53 : vector<1x128xf32>
    %cst_32 = arith.constant 1.000000e+00 : f32
    %55 = vector.broadcast %cst_32 : f32 to vector<1x128xf32>
    %56 = arith.addf %55, %54 : vector<1x128xf32>
    %57 = arith.divf %55, %56 : vector<1x128xf32>
    %58 = vector.extract_strided_slice %45 {offsets = [0, 128], sizes = [1, 128], strides = [1, 1]} : vector<8x384xf32> to vector<1x128xf32>
    %59 = vector.extract_strided_slice %49 {offsets = [0, 128], sizes = [1, 128], strides = [1, 1]} : vector<1x384xf32> to vector<1x128xf32>
    %60 = arith.addf %58, %59 : vector<1x128xf32>
    %61 = arith.negf %60 : vector<1x128xf32>
    %62 = math.exp %61 : vector<1x128xf32>
    %cst_33 = arith.constant 1.000000e+00 : f32
    %63 = vector.broadcast %cst_33 : f32 to vector<1x128xf32>
    %64 = arith.addf %63, %62 : vector<1x128xf32>
    %65 = arith.divf %63, %64 : vector<1x128xf32>
    %66 = vector.extract_strided_slice %45 {offsets = [0, 256], sizes = [1, 128], strides = [1, 1]} : vector<8x384xf32> to vector<1x128xf32>
    %67 = vector.extract_strided_slice %49 {offsets = [0, 256], sizes = [1, 128], strides = [1, 1]} : vector<1x384xf32> to vector<1x128xf32>
    %68 = arith.addf %67, %47 : vector<1x128xf32>
    %69 = arith.mulf %57, %68 : vector<1x128xf32>
    %70 = arith.addf %66, %69 : vector<1x128xf32>
    %71 = math.tanh %70 : vector<1x128xf32>
    %cst_34 = arith.constant 1.000000e+00 : f32
    %72 = vector.broadcast %cst_34 : f32 to vector<1x128xf32>
    %73 = arith.subf %72, %65 : vector<1x128xf32>
    %74 = arith.mulf %73, %71 : vector<1x128xf32>
    %75 = arith.mulf %65, %48 : vector<1x128xf32>
    %76 = arith.addf %74, %75 : vector<1x128xf32>
    %cst_35 = arith.constant dense<0.000000e+00> : vector<1x384xf32>
    %77 = tpu.matmul %76, %46, %cst_35 {dimension_numbers = #tpu.dot_dimension_numbers<[1], [0], [0], [1], [0, 0, 1, 1], [], []>} : vector<1x128xf32>, vector<128x384xf32>, vector<1x384xf32> -> vector<1x384xf32>
    %78 = vector.extract_strided_slice %45 {offsets = [1, 0], sizes = [1, 128], strides = [1, 1]} : vector<8x384xf32> to vector<1x128xf32>
    %79 = vector.extract_strided_slice %77 {offsets = [0, 0], sizes = [1, 128], strides = [1, 1]} : vector<1x384xf32> to vector<1x128xf32>
    %80 = arith.addf %78, %79 : vector<1x128xf32>
    %81 = arith.negf %80 : vector<1x128xf32>
    %82 = math.exp %81 : vector<1x128xf32>
    %cst_36 = arith.constant 1.000000e+00 : f32
    %83 = vector.broadcast %cst_36 : f32 to vector<1x128xf32>
    %84 = arith.addf %83, %82 : vector<1x128xf32>
    %85 = arith.divf %83, %84 : vector<1x128xf32>
    %86 = vector.extract_strided_slice %45 {offsets = [1, 128], sizes = [1, 128], strides = [1, 1]} : vector<8x384xf32> to vector<1x128xf32>
    %87 = vector.extract_strided_slice %77 {offsets = [0, 128], sizes = [1, 128], strides = [1, 1]} : vector<1x384xf32> to vector<1x128xf32>
    %88 = arith.addf %86, %87 : vector<1x128xf32>
    %89 = arith.negf %88 : vector<1x128xf32>
    %90 = math.exp %89 : vector<1x128xf32>
    %cst_37 = arith.constant 1.000000e+00 : f32
    %91 = vector.broadcast %cst_37 : f32 to vector<1x128xf32>
    %92 = arith.addf %91, %90 : vector<1x128xf32>
    %93 = arith.divf %91, %92 : vector<1x128xf32>
    %94 = vector.extract_strided_slice %45 {offsets = [1, 256], sizes = [1, 128], strides = [1, 1]} : vector<8x384xf32> to vector<1x128xf32>
    %95 = vector.extract_strided_slice %77 {offsets = [0, 256], sizes = [1, 128], strides = [1, 1]} : vector<1x384xf32> to vector<1x128xf32>
    %96 = arith.addf %95, %47 : vector<1x128xf32>
    %97 = arith.mulf %85, %96 : vector<1x128xf32>
    %98 = arith.addf %94, %97 : vector<1x128xf32>
    %99 = math.tanh %98 : vector<1x128xf32>
    %cst_38 = arith.constant 1.000000e+00 : f32
    %100 = vector.broadcast %cst_38 : f32 to vector<1x128xf32>
    %101 = arith.subf %100, %93 : vector<1x128xf32>
    %102 = arith.mulf %101, %99 : vector<1x128xf32>
    %103 = arith.mulf %93, %76 : vector<1x128xf32>
    %104 = arith.addf %102, %103 : vector<1x128xf32>
    %cst_39 = arith.constant dense<0.000000e+00> : vector<1x384xf32>
    %105 = tpu.matmul %104, %46, %cst_39 {dimension_numbers = #tpu.dot_dimension_numbers<[1], [0], [0], [1], [0, 0, 1, 1], [], []>} : vector<1x128xf32>, vector<128x384xf32>, vector<1x384xf32> -> vector<1x384xf32>
    %106 = vector.extract_strided_slice %45 {offsets = [2, 0], sizes = [1, 128], strides = [1, 1]} : vector<8x384xf32> to vector<1x128xf32>
    %107 = vector.extract_strided_slice %105 {offsets = [0, 0], sizes = [1, 128], strides = [1, 1]} : vector<1x384xf32> to vector<1x128xf32>
    %108 = arith.addf %106, %107 : vector<1x128xf32>
    %109 = arith.negf %108 : vector<1x128xf32>
    %110 = math.exp %109 : vector<1x128xf32>
    %cst_40 = arith.constant 1.000000e+00 : f32
    %111 = vector.broadcast %cst_40 : f32 to vector<1x128xf32>
    %112 = arith.addf %111, %110 : vector<1x128xf32>
    %113 = arith.divf %111, %112 : vector<1x128xf32>
    %114 = vector.extract_strided_slice %45 {offsets = [2, 128], sizes = [1, 128], strides = [1, 1]} : vector<8x384xf32> to vector<1x128xf32>
    %115 = vector.extract_strided_slice %105 {offsets = [0, 128], sizes = [1, 128], strides = [1, 1]} : vector<1x384xf32> to vector<1x128xf32>
    %116 = arith.addf %114, %115 : vector<1x128xf32>
    %117 = arith.negf %116 : vector<1x128xf32>
    %118 = math.exp %117 : vector<1x128xf32>
    %cst_41 = arith.constant 1.000000e+00 : f32
    %119 = vector.broadcast %cst_41 : f32 to vector<1x128xf32>
    %120 = arith.addf %119, %118 : vector<1x128xf32>
    %121 = arith.divf %119, %120 : vector<1x128xf32>
    %122 = vector.extract_strided_slice %45 {offsets = [2, 256], sizes = [1, 128], strides = [1, 1]} : vector<8x384xf32> to vector<1x128xf32>
    %123 = vector.extract_strided_slice %105 {offsets = [0, 256], sizes = [1, 128], strides = [1, 1]} : vector<1x384xf32> to vector<1x128xf32>
    %124 = arith.addf %123, %47 : vector<1x128xf32>
    %125 = arith.mulf %113, %124 : vector<1x128xf32>
    %126 = arith.addf %122, %125 : vector<1x128xf32>
    %127 = math.tanh %126 : vector<1x128xf32>
    %cst_42 = arith.constant 1.000000e+00 : f32
    %128 = vector.broadcast %cst_42 : f32 to vector<1x128xf32>
    %129 = arith.subf %128, %121 : vector<1x128xf32>
    %130 = arith.mulf %129, %127 : vector<1x128xf32>
    %131 = arith.mulf %121, %104 : vector<1x128xf32>
    %132 = arith.addf %130, %131 : vector<1x128xf32>
    %cst_43 = arith.constant dense<0.000000e+00> : vector<1x384xf32>
    %133 = tpu.matmul %132, %46, %cst_43 {dimension_numbers = #tpu.dot_dimension_numbers<[1], [0], [0], [1], [0, 0, 1, 1], [], []>} : vector<1x128xf32>, vector<128x384xf32>, vector<1x384xf32> -> vector<1x384xf32>
    %134 = vector.extract_strided_slice %45 {offsets = [3, 0], sizes = [1, 128], strides = [1, 1]} : vector<8x384xf32> to vector<1x128xf32>
    %135 = vector.extract_strided_slice %133 {offsets = [0, 0], sizes = [1, 128], strides = [1, 1]} : vector<1x384xf32> to vector<1x128xf32>
    %136 = arith.addf %134, %135 : vector<1x128xf32>
    %137 = arith.negf %136 : vector<1x128xf32>
    %138 = math.exp %137 : vector<1x128xf32>
    %cst_44 = arith.constant 1.000000e+00 : f32
    %139 = vector.broadcast %cst_44 : f32 to vector<1x128xf32>
    %140 = arith.addf %139, %138 : vector<1x128xf32>
    %141 = arith.divf %139, %140 : vector<1x128xf32>
    %142 = vector.extract_strided_slice %45 {offsets = [3, 128], sizes = [1, 128], strides = [1, 1]} : vector<8x384xf32> to vector<1x128xf32>
    %143 = vector.extract_strided_slice %133 {offsets = [0, 128], sizes = [1, 128], strides = [1, 1]} : vector<1x384xf32> to vector<1x128xf32>
    %144 = arith.addf %142, %143 : vector<1x128xf32>
    %145 = arith.negf %144 : vector<1x128xf32>
    %146 = math.exp %145 : vector<1x128xf32>
    %cst_45 = arith.constant 1.000000e+00 : f32
    %147 = vector.broadcast %cst_45 : f32 to vector<1x128xf32>
    %148 = arith.addf %147, %146 : vector<1x128xf32>
    %149 = arith.divf %147, %148 : vector<1x128xf32>
    %150 = vector.extract_strided_slice %45 {offsets = [3, 256], sizes = [1, 128], strides = [1, 1]} : vector<8x384xf32> to vector<1x128xf32>
    %151 = vector.extract_strided_slice %133 {offsets = [0, 256], sizes = [1, 128], strides = [1, 1]} : vector<1x384xf32> to vector<1x128xf32>
    %152 = arith.addf %151, %47 : vector<1x128xf32>
    %153 = arith.mulf %141, %152 : vector<1x128xf32>
    %154 = arith.addf %150, %153 : vector<1x128xf32>
    %155 = math.tanh %154 : vector<1x128xf32>
    %cst_46 = arith.constant 1.000000e+00 : f32
    %156 = vector.broadcast %cst_46 : f32 to vector<1x128xf32>
    %157 = arith.subf %156, %149 : vector<1x128xf32>
    %158 = arith.mulf %157, %155 : vector<1x128xf32>
    %159 = arith.mulf %149, %132 : vector<1x128xf32>
    %160 = arith.addf %158, %159 : vector<1x128xf32>
    %cst_47 = arith.constant dense<0.000000e+00> : vector<1x384xf32>
    %161 = tpu.matmul %160, %46, %cst_47 {dimension_numbers = #tpu.dot_dimension_numbers<[1], [0], [0], [1], [0, 0, 1, 1], [], []>} : vector<1x128xf32>, vector<128x384xf32>, vector<1x384xf32> -> vector<1x384xf32>
    %162 = vector.extract_strided_slice %45 {offsets = [4, 0], sizes = [1, 128], strides = [1, 1]} : vector<8x384xf32> to vector<1x128xf32>
    %163 = vector.extract_strided_slice %161 {offsets = [0, 0], sizes = [1, 128], strides = [1, 1]} : vector<1x384xf32> to vector<1x128xf32>
    %164 = arith.addf %162, %163 : vector<1x128xf32>
    %165 = arith.negf %164 : vector<1x128xf32>
    %166 = math.exp %165 : vector<1x128xf32>
    %cst_48 = arith.constant 1.000000e+00 : f32
    %167 = vector.broadcast %cst_48 : f32 to vector<1x128xf32>
    %168 = arith.addf %167, %166 : vector<1x128xf32>
    %169 = arith.divf %167, %168 : vector<1x128xf32>
    %170 = vector.extract_strided_slice %45 {offsets = [4, 128], sizes = [1, 128], strides = [1, 1]} : vector<8x384xf32> to vector<1x128xf32>
    %171 = vector.extract_strided_slice %161 {offsets = [0, 128], sizes = [1, 128], strides = [1, 1]} : vector<1x384xf32> to vector<1x128xf32>
    %172 = arith.addf %170, %171 : vector<1x128xf32>
    %173 = arith.negf %172 : vector<1x128xf32>
    %174 = math.exp %173 : vector<1x128xf32>
    %cst_49 = arith.constant 1.000000e+00 : f32
    %175 = vector.broadcast %cst_49 : f32 to vector<1x128xf32>
    %176 = arith.addf %175, %174 : vector<1x128xf32>
    %177 = arith.divf %175, %176 : vector<1x128xf32>
    %178 = vector.extract_strided_slice %45 {offsets = [4, 256], sizes = [1, 128], strides = [1, 1]} : vector<8x384xf32> to vector<1x128xf32>
    %179 = vector.extract_strided_slice %161 {offsets = [0, 256], sizes = [1, 128], strides = [1, 1]} : vector<1x384xf32> to vector<1x128xf32>
    %180 = arith.addf %179, %47 : vector<1x128xf32>
    %181 = arith.mulf %169, %180 : vector<1x128xf32>
    %182 = arith.addf %178, %181 : vector<1x128xf32>
    %183 = math.tanh %182 : vector<1x128xf32>
    %cst_50 = arith.constant 1.000000e+00 : f32
    %184 = vector.broadcast %cst_50 : f32 to vector<1x128xf32>
    %185 = arith.subf %184, %177 : vector<1x128xf32>
    %186 = arith.mulf %185, %183 : vector<1x128xf32>
    %187 = arith.mulf %177, %160 : vector<1x128xf32>
    %188 = arith.addf %186, %187 : vector<1x128xf32>
    %cst_51 = arith.constant dense<0.000000e+00> : vector<1x384xf32>
    %189 = tpu.matmul %188, %46, %cst_51 {dimension_numbers = #tpu.dot_dimension_numbers<[1], [0], [0], [1], [0, 0, 1, 1], [], []>} : vector<1x128xf32>, vector<128x384xf32>, vector<1x384xf32> -> vector<1x384xf32>
    %190 = vector.extract_strided_slice %45 {offsets = [5, 0], sizes = [1, 128], strides = [1, 1]} : vector<8x384xf32> to vector<1x128xf32>
    %191 = vector.extract_strided_slice %189 {offsets = [0, 0], sizes = [1, 128], strides = [1, 1]} : vector<1x384xf32> to vector<1x128xf32>
    %192 = arith.addf %190, %191 : vector<1x128xf32>
    %193 = arith.negf %192 : vector<1x128xf32>
    %194 = math.exp %193 : vector<1x128xf32>
    %cst_52 = arith.constant 1.000000e+00 : f32
    %195 = vector.broadcast %cst_52 : f32 to vector<1x128xf32>
    %196 = arith.addf %195, %194 : vector<1x128xf32>
    %197 = arith.divf %195, %196 : vector<1x128xf32>
    %198 = vector.extract_strided_slice %45 {offsets = [5, 128], sizes = [1, 128], strides = [1, 1]} : vector<8x384xf32> to vector<1x128xf32>
    %199 = vector.extract_strided_slice %189 {offsets = [0, 128], sizes = [1, 128], strides = [1, 1]} : vector<1x384xf32> to vector<1x128xf32>
    %200 = arith.addf %198, %199 : vector<1x128xf32>
    %201 = arith.negf %200 : vector<1x128xf32>
    %202 = math.exp %201 : vector<1x128xf32>
    %cst_53 = arith.constant 1.000000e+00 : f32
    %203 = vector.broadcast %cst_53 : f32 to vector<1x128xf32>
    %204 = arith.addf %203, %202 : vector<1x128xf32>
    %205 = arith.divf %203, %204 : vector<1x128xf32>
    %206 = vector.extract_strided_slice %45 {offsets = [5, 256], sizes = [1, 128], strides = [1, 1]} : vector<8x384xf32> to vector<1x128xf32>
    %207 = vector.extract_strided_slice %189 {offsets = [0, 256], sizes = [1, 128], strides = [1, 1]} : vector<1x384xf32> to vector<1x128xf32>
    %208 = arith.addf %207, %47 : vector<1x128xf32>
    %209 = arith.mulf %197, %208 : vector<1x128xf32>
    %210 = arith.addf %206, %209 : vector<1x128xf32>
    %211 = math.tanh %210 : vector<1x128xf32>
    %cst_54 = arith.constant 1.000000e+00 : f32
    %212 = vector.broadcast %cst_54 : f32 to vector<1x128xf32>
    %213 = arith.subf %212, %205 : vector<1x128xf32>
    %214 = arith.mulf %213, %211 : vector<1x128xf32>
    %215 = arith.mulf %205, %188 : vector<1x128xf32>
    %216 = arith.addf %214, %215 : vector<1x128xf32>
    %cst_55 = arith.constant dense<0.000000e+00> : vector<1x384xf32>
    %217 = tpu.matmul %216, %46, %cst_55 {dimension_numbers = #tpu.dot_dimension_numbers<[1], [0], [0], [1], [0, 0, 1, 1], [], []>} : vector<1x128xf32>, vector<128x384xf32>, vector<1x384xf32> -> vector<1x384xf32>
    %218 = vector.extract_strided_slice %45 {offsets = [6, 0], sizes = [1, 128], strides = [1, 1]} : vector<8x384xf32> to vector<1x128xf32>
    %219 = vector.extract_strided_slice %217 {offsets = [0, 0], sizes = [1, 128], strides = [1, 1]} : vector<1x384xf32> to vector<1x128xf32>
    %220 = arith.addf %218, %219 : vector<1x128xf32>
    %221 = arith.negf %220 : vector<1x128xf32>
    %222 = math.exp %221 : vector<1x128xf32>
    %cst_56 = arith.constant 1.000000e+00 : f32
    %223 = vector.broadcast %cst_56 : f32 to vector<1x128xf32>
    %224 = arith.addf %223, %222 : vector<1x128xf32>
    %225 = arith.divf %223, %224 : vector<1x128xf32>
    %226 = vector.extract_strided_slice %45 {offsets = [6, 128], sizes = [1, 128], strides = [1, 1]} : vector<8x384xf32> to vector<1x128xf32>
    %227 = vector.extract_strided_slice %217 {offsets = [0, 128], sizes = [1, 128], strides = [1, 1]} : vector<1x384xf32> to vector<1x128xf32>
    %228 = arith.addf %226, %227 : vector<1x128xf32>
    %229 = arith.negf %228 : vector<1x128xf32>
    %230 = math.exp %229 : vector<1x128xf32>
    %cst_57 = arith.constant 1.000000e+00 : f32
    %231 = vector.broadcast %cst_57 : f32 to vector<1x128xf32>
    %232 = arith.addf %231, %230 : vector<1x128xf32>
    %233 = arith.divf %231, %232 : vector<1x128xf32>
    %234 = vector.extract_strided_slice %45 {offsets = [6, 256], sizes = [1, 128], strides = [1, 1]} : vector<8x384xf32> to vector<1x128xf32>
    %235 = vector.extract_strided_slice %217 {offsets = [0, 256], sizes = [1, 128], strides = [1, 1]} : vector<1x384xf32> to vector<1x128xf32>
    %236 = arith.addf %235, %47 : vector<1x128xf32>
    %237 = arith.mulf %225, %236 : vector<1x128xf32>
    %238 = arith.addf %234, %237 : vector<1x128xf32>
    %239 = math.tanh %238 : vector<1x128xf32>
    %cst_58 = arith.constant 1.000000e+00 : f32
    %240 = vector.broadcast %cst_58 : f32 to vector<1x128xf32>
    %241 = arith.subf %240, %233 : vector<1x128xf32>
    %242 = arith.mulf %241, %239 : vector<1x128xf32>
    %243 = arith.mulf %233, %216 : vector<1x128xf32>
    %244 = arith.addf %242, %243 : vector<1x128xf32>
    %cst_59 = arith.constant dense<0.000000e+00> : vector<1x384xf32>
    %245 = tpu.matmul %244, %46, %cst_59 {dimension_numbers = #tpu.dot_dimension_numbers<[1], [0], [0], [1], [0, 0, 1, 1], [], []>} : vector<1x128xf32>, vector<128x384xf32>, vector<1x384xf32> -> vector<1x384xf32>
    %246 = vector.extract_strided_slice %45 {offsets = [7, 0], sizes = [1, 128], strides = [1, 1]} : vector<8x384xf32> to vector<1x128xf32>
    %247 = vector.extract_strided_slice %245 {offsets = [0, 0], sizes = [1, 128], strides = [1, 1]} : vector<1x384xf32> to vector<1x128xf32>
    %248 = arith.addf %246, %247 : vector<1x128xf32>
    %249 = arith.negf %248 : vector<1x128xf32>
    %250 = math.exp %249 : vector<1x128xf32>
    %cst_60 = arith.constant 1.000000e+00 : f32
    %251 = vector.broadcast %cst_60 : f32 to vector<1x128xf32>
    %252 = arith.addf %251, %250 : vector<1x128xf32>
    %253 = arith.divf %251, %252 : vector<1x128xf32>
    %254 = vector.extract_strided_slice %45 {offsets = [7, 128], sizes = [1, 128], strides = [1, 1]} : vector<8x384xf32> to vector<1x128xf32>
    %255 = vector.extract_strided_slice %245 {offsets = [0, 128], sizes = [1, 128], strides = [1, 1]} : vector<1x384xf32> to vector<1x128xf32>
    %256 = arith.addf %254, %255 : vector<1x128xf32>
    %257 = arith.negf %256 : vector<1x128xf32>
    %258 = math.exp %257 : vector<1x128xf32>
    %cst_61 = arith.constant 1.000000e+00 : f32
    %259 = vector.broadcast %cst_61 : f32 to vector<1x128xf32>
    %260 = arith.addf %259, %258 : vector<1x128xf32>
    %261 = arith.divf %259, %260 : vector<1x128xf32>
    %262 = vector.extract_strided_slice %45 {offsets = [7, 256], sizes = [1, 128], strides = [1, 1]} : vector<8x384xf32> to vector<1x128xf32>
    %263 = vector.extract_strided_slice %245 {offsets = [0, 256], sizes = [1, 128], strides = [1, 1]} : vector<1x384xf32> to vector<1x128xf32>
    %264 = arith.addf %263, %47 : vector<1x128xf32>
    %265 = arith.mulf %253, %264 : vector<1x128xf32>
    %266 = arith.addf %262, %265 : vector<1x128xf32>
    %267 = math.tanh %266 : vector<1x128xf32>
    %cst_62 = arith.constant 1.000000e+00 : f32
    %268 = vector.broadcast %cst_62 : f32 to vector<1x128xf32>
    %269 = arith.subf %268, %261 : vector<1x128xf32>
    %270 = arith.mulf %269, %267 : vector<1x128xf32>
    %271 = arith.mulf %261, %244 : vector<1x128xf32>
    %272 = arith.addf %270, %271 : vector<1x128xf32>
    %273 = tpu.concatenate %76, %104, %132, %160, %188, %216, %244, %272 in 0 : vector<1x128xf32>, vector<1x128xf32>, vector<1x128xf32>, vector<1x128xf32>, vector<1x128xf32>, vector<1x128xf32>, vector<1x128xf32>, vector<1x128xf32> -> vector<8x128xf32>
    %c0_63 = arith.constant 0 : index
    %c0_64 = arith.constant 0 : index
    %274 = vector.load %arg6[%c0_63, %c0_64] : memref<128x128xf32, #tpu.memory_space<vmem>>, vector<128x128xf32>
    %cst_65 = arith.constant dense<0.000000e+00> : vector<8x128xf32>
    %275 = tpu.matmul %273, %274, %cst_65 {dimension_numbers = #tpu.dot_dimension_numbers<[1], [0], [0], [1], [0, 0, 1, 1], [], []>} : vector<8x128xf32>, vector<128x128xf32>, vector<8x128xf32> -> vector<8x128xf32>
    %c0_66 = arith.constant 0 : index
    %c0_67 = arith.constant 0 : index
    %276 = vector.load %arg7[%c0_66, %c0_67] : memref<1x128xf32, #tpu.memory_space<vmem>>, vector<1x128xf32>
    %277 = vector.broadcast %276 : vector<1x128xf32> to vector<8x128xf32>
    %278 = arith.addf %275, %277 : vector<8x128xf32>
    %cst_68 = arith.constant dense<0xFF800000> : vector<8xf32>
    %279 = vector.multi_reduction <maximumf>, %278, %cst_68 [1] : vector<8x128xf32> to vector<8xf32>
    %280 = vector.shape_cast %279 : vector<8xf32> to vector<8x1xf32>
    %281 = vector.broadcast %280 : vector<8x1xf32> to vector<8x128xf32>
    %282 = arith.subf %278, %281 : vector<8x128xf32>
    %283 = math.exp %282 : vector<8x128xf32>
    %cst_69 = arith.constant dense<0.000000e+00> : vector<8xf32>
    %284 = vector.multi_reduction <add>, %283, %cst_69 [1] : vector<8x128xf32> to vector<8xf32>
    %285 = vector.shape_cast %284 : vector<8xf32> to vector<8x1xf32>
    %286 = math.log %285 : vector<8x1xf32>
    %287 = vector.broadcast %286 : vector<8x1xf32> to vector<8x128xf32>
    %288 = arith.subf %282, %287 : vector<8x128xf32>
    %c0_70 = arith.constant 0 : index
    %c0_71 = arith.constant 0 : index
    %289 = vector.load %arg8[%c0_70, %c0_71] : memref<8x128xf32, #tpu.memory_space<vmem>>, vector<8x128xf32>
    tpu.vector_store %arg8[%c0_70, %c0_71], %288 {strides = array<i32>} : memref<8x128xf32, #tpu.memory_space<vmem>>, vector<8x128xf32>,
    return
  }
}

</mosaic_0001>

<bundles_post_ra>
// kernel: tpu_custom_call.1
= control target key start
LH: loop header
LB: loop body
LE: loop exit
PB: predicated region body
PF: predicated region fallthrough
CT: control target
= control target key end

     0   :  { %13 = vsyncpa [#allocation5], 0  ;;  %s2571_s0 = inlined_call_operand.hbm [shape: s32[8], index: 0, kind: input, shape index: {}]   ;;  %s2572_s1 = inlined_call_operand.hbm [shape: f32[16,32], index: 1, kind: input, shape index: {}]   ;;  %s2573_s2 = inlined_call_operand.hbm [shape: f32[32,384], index: 2, kind: input, shape index: {}]   ;;  %s2574_s3 = inlined_call_operand.hbm [shape: f32[128,384], index: 3, kind: input, shape index: {}]   ;;  %s2575_s4 = inlined_call_operand.vmem [shape: f32[1,384], index: 4, kind: input, shape index: {}]   ;;  %s2576_s5 = inlined_call_operand.vmem [shape: f32[1,128], index: 5, kind: input, shape index: {}]   ;;  %s2577_s6 = inlined_call_operand.hbm [shape: f32[128,128], index: 6, kind: input, shape index: {}]   ;;  %s2578_s7 = inlined_call_operand.vmem [shape: f32[1,128], index: 7, kind: input, shape index: {}]   ;;  %s2579_s8 = inlined_call_operand.hbm [shape: f32[8,128], index: 8, kind: output, shape index: {}]  }
   0x1   :  { %14 = vsyncpa [#allocation3], 0 }
   0x2   :  { %15 = vsyncpa [#allocation8], 0 }
   0x3   :  { %16 = vsyncpa [#allocation11], 0  ;;  %s44_s29 = sshll.u32 %s2573_s2, 4  ;;  %s45_s29 = int_to_ptr.hbm [resolvable:$true] %s44_s29 }
   0x4   :  { %17 = vsyncpa [#allocation4], 0  ;;  %s1745_s30 = smov [#allocation7]   ;;  %s23_s12 = sshll.u32 %s2571_s0, 4  ;;  %s24_s12 = int_to_ptr.hbm [resolvable:$true] %s23_s12 }
   0x5   :  { %s46_s9 = sshll.u32 %s1745_s30, 4  ;;  %s1746_s13 = smov 384   ;;  %s47_s9 = int_to_ptr.vmem [resolvable:$true] %s46_s9 }
   0x6   :  { %s1747_s14 = smov 24   ;;  %s1748_s15 = smov [#allocation2]  }
   0x7   :  { %52 = dma.hbm_to_vmem [thread:$0]  %s45_s29, 1536, %s47_s9, [#allocation8], %s1746_s13, %s1746_s13, %s1747_s14  }
   0x8   :  { %26 = dma.hbm_to_smem %s24_s12, 16, %s1748_s15, [#allocation5]  }
   0x9   :  { %s31_s18 = sshll.u32 %s2572_s1, 4  ;;  %s1749_s2 = smov [#allocation6]   ;;  %s32_s18 = int_to_ptr.hbm [resolvable:$true] %s31_s18 }
   0xa   :  { %s33_s19 = sshll.u32 %s1749_s2, 4  ;;  %s57_s22 = sshll.u32 %s2574_s3, 4  ;;  %s34_s19 = int_to_ptr.vmem [resolvable:$true] %s33_s19  ;;  %s58_s22 = int_to_ptr.hbm [resolvable:$true] %s57_s22 }
   0xb   :  { %s1750_s23 = smov 128   ;;  %s1751_s0 = smov 8  }
   0xc   :  { %39 = dma.hbm_to_vmem [thread:$0]  %s32_s18, 256, %s34_s19, [#allocation3], %s1750_s23, %s1750_s23, %s1751_s0  }
   0xd   :  { %s1752_s24 = smov [#allocation9]   ;;  %s74_s28 = sshll.u32 %s2577_s6, 4  ;;  %s75_s28 = int_to_ptr.hbm [resolvable:$true] %s74_s28 }
   0xe   :  { %s59_s25 = sshll.u32 %s1752_s24, 4  ;;  %s1753_s1 = smov [#allocation10]   ;;  %s60_s25 = int_to_ptr.vmem [resolvable:$true] %s59_s25 }
   0xf   :  { %65 = dma.hbm_to_vmem [thread:$0]  %s58_s22, 6144, %s60_s25, [#allocation8], %s1746_s13, %s1746_s13, %s1747_s14  }
  0x10   :  { %s76_s29 = sshll.u32 %s1753_s1, 4  ;;  %s77_s29 = int_to_ptr.vmem [resolvable:$true] %s76_s29 }
  0x11   :  { %82 = dma.hbm_to_vmem [thread:$0]  %s75_s28, 2048, %s77_s29, [#allocation11], %s1750_s23, %s1750_s23, %s1751_s0  }
  0x12   :  { %1735 = dma.done.wait [#allocation5], 16  }
  0x13   :  { %1736 = vsyncadd [#allocation5], 4294967280 }
  0x14   :  { %1737 = dma.done.wait [#allocation3], 256  }
  0x15   :  { %1738 = vsyncadd [#allocation3], 4294967040 }
  0x16   :  { %1739 = dma.done.wait [#allocation8], 7680  }
  0x17   :  { %1740 = vsyncadd [#allocation8], 4294959616 }
  0x18   :  { %1741 = dma.done.wait [#allocation11], 2048  }
  0x19   :  { %1742 = vsyncadd [#allocation11], 4294965248 }
  0x1a   :  { %105 = sfence }
  0x1b   :  { %v206_v0 = vld [vmem:[#allocation7 + $0x48] sm:$0xff]  ;;  %v203_v2 = vld [vmem:[#allocation7 + $0x30] sm:$0xff]  ;;  %s1818_s3 = sld [smem:[#allocation2]]  ;;  %v200_v4 = vld [vmem:[#allocation7 + $0x18] sm:$0xff]  ;;  %vm183_vm0 = vcmask 1040384   ;;  %vm185_vm1 = vcmask 1041408  }
  0x1c   :  { %v1816_v1 = vld [vmem:[#allocation9 + $0x168] sm:$0xff]  ;;  %233 = vmatpush.msra.mxu0 %v206_v0  ;;  %v1821_v3 = vld [vmem:[#allocation9 + $0x150] sm:$0xff]  ;;  %s1823_s6 = sld [smem:[#allocation2 + $0x1]]  ;;  %v1825_v5 = vld [vmem:[#allocation9 + $0x138] sm:$0xff]  ;;  %vm187_vm2 = vcmask 1042432   ;;  %vm189_vm3 = vcmask 1043456  }
  0x1d   :  { %330 = vmatpush.msra.mxu3 %v1816_v1  ;;  %s1827_s30 = sld [smem:[#allocation2 + $0x2]]  ;;  %v197_v6 = vld [vmem:[#allocation7] sm:$0xff]  ;;  %v1837_v8 = vld [vmem:[#allocation9 + $0x170] sm:$0xff]  ;;  %v1841_v9 = vld [vmem:[#allocation9 + $0x108] sm:$0xff]  ;;  %v1754_v0 = vmov 0.0   ;;  %vm191_vm4 = vcmask 1044480  }
  0x1e   :  { %234 = vmatpush.msra.mxu0 %v203_v2  ;;  %s1830_s9 = sld [smem:[#allocation2 + $0x3]]  ;;  %v1832_v7 = vld [vmem:[#allocation9 + $0x120] sm:$0xff]  ;;  %v1846_v10 = vld [vmem:[#allocation9 + $0x158] sm:$0xff]  ;;  %v1851_v11 = vld [vmem:[#allocation9 + $0xf0] sm:$0xff]  ;;  %vm193_vm5 = vcmask 1045504   ;;  %vm195_vm6 = vcmask 1046528  }
  0x1f   :  { %331 = vmatpush.msra.mxu3 %v1821_v3  ;;  %s1834_s10 = sld [smem:[#allocation2 + $0x4]]  ;;  %v1855_v12 = vld [vmem:[#allocation9 + $0x140] sm:$0xff]  ;;  %v207_v13 = vld [vmem:[#allocation7 + $0x50] sm:$0xff]  ;;  %v1859_v14 = vld [vmem:[#allocation9 + $0xd8] sm:$0xff]  ;;  %vm217_vm7 = vcmask 261120  }
  0x20   :  { %235 = vmatpush.msra.mxu0 %v200_v4  ;;  %s1839_s11 = sld [smem:[#allocation2 + $0x5]]  ;;  %253 = vmatpush.msra.mxu1 %v207_v13  ;;  %v204_v15 = vld [vmem:[#allocation7 + $0x38] sm:$0xff]  ;;  %v1866_v16 = vld [vmem:[#allocation9 + $0x128] sm:$0xff]  ;;  %v1873_v17 = vld [vmem:[#allocation9 + $0xc0] sm:$0xff] }
  0x21   :  { %332 = vmatpush.msra.mxu3 %v1825_v5  ;;  %p107_p0 = scmp.gt.s32.totalorder %s1818_s3, 0  ;;  %p1376_p1 = scmp.lt.s32.totalorder %s1818_s3, 15  ;;  %v1877_v18 = vld [vmem:[#allocation9 + $0x110] sm:$0xff]  ;;  %v201_v19 = vld [vmem:[#allocation7 + $0x20] sm:$0xff]  ;;  %v1881_v20 = vld [vmem:[#allocation9 + $0xa8] sm:$0xff] }
  0x22   :  { %236 = vmatpush.msra.mxu0 %v197_v6  ;;  %p114_p2 = scmp.gt.s32.totalorder %s1823_s6, 0  ;;  %p1382_p3 = scmp.lt.s32.totalorder %s1823_s6, 15  ;;  %254 = vmatpush.msra.mxu1 %v204_v15  ;;  %v198_v21 = vld [vmem:[#allocation7 + $0x8] sm:$0xff]  ;;  %v1885_v22 = vld [vmem:[#allocation9 + $0xf8] sm:$0xff]  ;;  %v1892_v24 = vld [vmem:[#allocation9 + $0x90] sm:$0xff] }
  0x23   :  { %333 = vmatpush.msra.mxu3 %v1832_v7  ;;  %s108_s12 = scalar_select %p107_p0, %s1818_s3, 0  ;;  %v1889_v23 = vld [vmem:[#allocation9 + $0x178] sm:$0xff]  ;;  %v1896_v25 = vld [vmem:[#allocation9 + $0x160] sm:$0xff]  ;;  %v1908_v28 = vld [vmem:[#allocation9 + $0xc8] sm:$0xff] }
  0x24   :  { %350 = vmatpush.msrb.mxu0 %v1837_v8  ;;  %s115_s13 = scalar_select %p114_p2, %s1823_s6, 0  ;;  %255 = vmatpush.msra.mxu1 %v201_v19  ;;  %v1899_v26 = vld [vmem:[#allocation9 + $0xe0] sm:$0xff]  ;;  %v1904_v27 = vld [vmem:[#allocation9 + $0x78] sm:$0xff]  ;;  %v1920_v31 = vld [vmem:[#allocation9 + $0x148] sm:$0xff] }
  0x25   :  { %334 = vmatpush.msra.mxu3 %v1841_v9  ;;  %s2635_s12 = smov (!%p1376_p1, %s108_s12), 15  ;;  %p121_p4 = scmp.gt.s32.totalorder %s1827_s30, 0  ;;  %v1917_v30 = vld [vmem:[#allocation9 + $0x60] sm:$0xff]  ;;  %v1923_v32 = vld [vmem:[#allocation9 + $0xb0] sm:$0xff]  ;;  %v1930_v35 = vld [vmem:[#allocation9 + $0x48] sm:$0xff] }
  0x26   :  { %351 = vmatpush.msrb.mxu0 %v1846_v10  ;;  %s2637_s13 = smov (!%p1382_p3, %s115_s13), 15  ;;  %p1388_p5 = scmp.lt.s32.totalorder %s1827_s30, 15  ;;  %256 = vmatpush.msra.mxu1 %v198_v21  ;;  %v1927_v34 = vld [vmem:[#allocation9 + $0x130] sm:$0xff]  ;;  %v1932_v36 = vld [vmem:[#allocation9 + $0x98] sm:$0xff]  ;;  %v1948_v42 = vld [vmem:[#allocation9 + $0x80] sm:$0xff] }
  0x27   :  { %335 = vmatpush.msra.mxu3 %v1851_v11  ;;  %s122_s14 = scalar_select %p121_p4, %s1827_s30, 0  ;;  %v1936_v38 = vld [vmem:[#allocation9 + $0x118] sm:$0xff]  ;;  %v1939_v39 = vld [vmem:[#allocation9 + $0x30] sm:$0xff]  ;;  %v1953_v44 = vld [vmem:[#allocation9 + $0x100] sm:$0xff] }
  0x28   :  { %352 = vmatpush.msrb.mxu0 %v1855_v12  ;;  %p128_p6 = scmp.gt.s32.totalorder %s1830_s9, 0  ;;  %p1394_p7 = scmp.lt.s32.totalorder %s1830_s9, 15  ;;  %370 = vmatpush.msrb.mxu1 %v1889_v23  ;;  %2602 = vst [vmem:[#allocation18_spill] sm:$0xff] %v1939_v39  ;;  %v208_v41 = vld [vmem:[#allocation7 + $0x58] sm:$0xff]  ;;  %v205_v45 = vld [vmem:[#allocation7 + $0x40] sm:$0xff]  ;;  %v202_v47 = vld [vmem:[#allocation7 + $0x28] sm:$0xff] }
  0x29   :  { %336 = vmatpush.msra.mxu3 %v1859_v14  ;;  %s2639_s14 = smov (!%p1388_p5, %s122_s14), 15  ;;  %p135_p8 = scmp.gt.s32.totalorder %s1834_s10, 0  ;;  %273 = vmatpush.msra.mxu2 %v208_v41  ;;  %v1961_v48 = vld [vmem:[#allocation9 + $0x18] sm:$0xff]  ;;  %v1966_v50 = vld [vmem:[#allocation9 + $0xe8] sm:$0xff]  ;;  %v199_v52 = vld [vmem:[#allocation7 + $0x10] sm:$0xff] }
  0x2a   :  { %353 = vmatpush.msrb.mxu0 %v1866_v16  ;;  %s129_s15 = scalar_select %p128_p6, %s1830_s9, 0  ;;  %371 = vmatpush.msrb.mxu1 %v1896_v25  ;;  %2603 = vst [vmem:[#allocation19_spill] sm:$0xff] %v1961_v48  ;;  %v1969_v51 = vld [vmem:[#allocation9 + $0x68] sm:$0xff]  ;;  %v1976_v55 = vld [vmem:[#allocation9] sm:$0xff]  ;;  %v1978_v56 = vld [vmem:[#allocation9 + $0xd0] sm:$0xff] }
  0x2b   :  { %337 = vmatpush.msra.mxu3 %v1873_v17  ;;  %s118_s16 = scalar_lea.vmem [#allocation6], %s2637_s13  ;;  %s125_s18 = scalar_lea.vmem [#allocation6], %s2639_s14  ;;  %274 = vmatpush.msra.mxu2 %v205_v45  ;;  %2604 = vst [vmem:[#allocation20_spill] sm:$0xff] %v1976_v55  ;;  %v1982_v58 = vld [vmem:[#allocation9 + $0x50] sm:$0xff]  ;;  %v1986_v59 = vld [vmem:[#allocation9 + $0xb8] sm:$0xff]  ;;  %v1997_v2 = vld [vmem:[#allocation9 + $0xa0] sm:$0xff] }
  0x2c   :  { %354 = vmatpush.msrb.mxu0 %v1877_v18  ;;  %v119_v29 = vld [vmem:[%s118_s16] sm:$0x1]  ;;  %s2641_s15 = smov (!%p1394_p7, %s129_s15), 15  ;;  %p1400_p9 = scmp.lt.s32.totalorder %s1834_s10, 15  ;;  %372 = vmatpush.msrb.mxu1 %v1920_v31  ;;  %v1991_v62 = vld [vmem:[#allocation9 + $0x38] sm:$0xff]  ;;  %v2000_v4 = vld [vmem:[#allocation9 + $0x20] sm:$0xff] }
  0x2d   :  { %338 = vmatpush.msra.mxu3 %v1881_v20  ;;  %s136_s17 = scalar_select %p135_p8, %s1834_s10, 0  ;;  %v126_v33 = vld [vmem:[%s125_s18] sm:$0x1]  ;;  %v163_v37 = vrot.slane %v119_v29, 7  ;;  %275 = vmatpush.msra.mxu2 %v202_v47  ;;  %2605 = vst [vmem:[#allocation21_spill] sm:$0xff] %v1991_v62  ;;  %v2007_v13 = vld [vmem:[#allocation9 + $0x88] sm:$0xff] }
  0x2e   :  { %355 = vmatpush.msrb.mxu0 %v1885_v22  ;;  %p142_p10 = scmp.gt.s32.totalorder %s1839_s11, 0  ;;  %p1406_p11 = scmp.lt.s32.totalorder %s1839_s11, 15  ;;  %373 = vmatpush.msrb.mxu1 %v1927_v34  ;;  %v166_v43 = vrot.slane %v126_v33, 6  ;;  %2606 = vst [vmem:[#allocation22_spill] sm:$0xff] %v2000_v4  ;;  %v2013_v19 = vld [vmem:[#allocation9 + $0x8] sm:$0xff]  ;;  %v2019_v21 = vld [vmem:[#allocation9 + $0x70] sm:$0xff] }
  0x2f   :  { %339 = vmatpush.msra.mxu3 %v1892_v24  ;;  %s111_s2 = scalar_lea.vmem [#allocation6], %s2635_s12  ;;  %s2643_s17 = smov (!%p1400_p9, %s136_s17), 15  ;;  %276 = vmatpush.msra.mxu2 %v199_v52  ;;  %2607 = vst [vmem:[#allocation23_spill] sm:$0xff] %v2013_v19  ;;  %v2033_v41 = vld [vmem:[#allocation9 + $0x40] sm:$0xff]  ;;  %v2041_v47 = vld [vmem:[#allocation9 + $0x28] sm:$0xff]  ;;  %v2046_v52 = vld [vmem:[#allocation9 + $0x10] sm:$0xff] }
  0x30   :  { %356 = vmatpush.msrb.mxu0 %v1899_v26  ;;  %v112_v40 = vld [vmem:[%s111_s2] sm:$0x1]  ;;  %s143_s19 = scalar_select %p142_p10, %s1839_s11, 0  ;;  %374 = vmatpush.msrb.mxu1 %v1936_v38  ;;  %2608 = vst [vmem:[#allocation24_spill] sm:$0xff] %v2041_v47 }
  0x31   :  { %340 = vmatpush.msra.mxu3 %v1904_v27  ;;  %s132_s20 = scalar_lea.vmem [#allocation6], %s2641_s15  ;;  %s1957_s21 = sld [smem:[#allocation2 + $0x6]]  ;;  %v184_v49 = vsel %vm183_vm0, %v112_v40, %v163_v37  ;;  %438 = vmatpush.msrb.mxu2 %v1816_v1  ;;  %v2028_v37 = vld [vmem:[#allocation9 + $0x58] sm:$0xff]  ;;  %2609 = vst [vmem:[#allocation25_spill] sm:$0xff] %v2046_v52 }
  0x32   :  { %357 = vmatpush.msrb.mxu0 %v1908_v28  ;;  %v133_v46 = vld [vmem:[%s132_s20] sm:$0x1]  ;;  %s2645_s19 = smov (!%p1406_p11, %s143_s19), 15  ;;  %s1971_s22 = sld [smem:[#allocation2 + $0x7]]  ;;  %375 = vmatpush.msrb.mxu1 %v1953_v44  ;;  %v186_v57 = vsel %vm185_vm1, %v184_v49, %v166_v43 }
  0x33   :  { %341 = vmatpush.msra.mxu3 %v1917_v30  ;;  %s139_s23 = scalar_lea.vmem [#allocation6], %s2643_s17  ;;  %v169_v54 = vrot.slane %v133_v46, 5  ;;  %s146_s0 = scalar_lea.vmem [#allocation6], %s2645_s19  ;;  %439 = vmatpush.msrb.mxu2 %v1821_v3 }
  0x34   :  { %358 = vmatpush.msrb.mxu0 %v1923_v32  ;;  %v140_v53 = vld [vmem:[%s139_s23] sm:$0x1]  ;;  %376 = vmatpush.msrb.mxu1 %v1966_v50  ;;  %s1755_s9 = smov [#allocation12]   ;;  %s1355_s13 = sshll.u32 %s2579_s8, 4  ;;  %s1356_s13 = int_to_ptr.hbm [resolvable:$true] %s1355_s13 }
  0x35   :  { %342 = vmatpush.msra.mxu3 %v1930_v35  ;;  %v147_v60 = vld [vmem:[%s146_s0] sm:$0x1]  ;;  %v172_v61 = vrot.slane %v140_v53, 4  ;;  %v188_v63 = vsel %vm187_vm2, %v186_v57, %v169_v54  ;;  %440 = vmatpush.msrb.mxu2 %v1825_v5  ;;  %s1353_s10 = sshll.u32 %s1755_s9, 4  ;;  %s1354_s10 = int_to_ptr.vmem [resolvable:$true] %s1353_s10 }
  0x36   :  { %359 = vmatpush.msrb.mxu0 %v1932_v36  ;;  %377 = vmatpush.msrb.mxu1 %v1978_v56  ;;  %v175_v6 = vrot.slane %v147_v60, 3  ;;  %v209_v53 = vld [vmem:[%s2575_s4] sm:$0x7] }
  0x37   :  { %343 = vmatpush.msra.mxu3 %v1939_v39  ;;  %p149_p12 = scmp.gt.s32.totalorder %s1957_s21, 0  ;;  %p1412_p13 = scmp.lt.s32.totalorder %s1957_s21, 15  ;;  %v190_v15 = vsel %vm189_vm3, %v188_v63, %v172_v61  ;;  %441 = vmatpush.msrb.mxu2 %v1832_v7  ;;  %v211_v54 = vperm.slane %v209_v53, 0  ;;  %v212_v63 = vperm.slane %v209_v53, 1 }
  0x38   :  { %360 = vmatpush.msrb.mxu0 %v1948_v42  ;;  %378 = vmatpush.msrb.mxu1 %v1986_v59  ;;  %p156_p0 = scmp.gt.s32.totalorder %s1971_s22, 0  ;;  %p1418_p1 = scmp.lt.s32.totalorder %s1971_s22, 15  ;;  %v192_v33 = vsel %vm191_vm4, %v190_v15, %v175_v6 }
  0x39   :  { %344 = vmatpush.msra.mxu3 %v1961_v48  ;;  %s150_s24 = scalar_select %p149_p12, %s1957_s21, 0  ;;  %442 = vmatpush.msrb.mxu2 %v1841_v9 }
  0x3a   :  { %361 = vmatpush.msrb.mxu0 %v1969_v51  ;;  %379 = vmatpush.msrb.mxu1 %v1997_v2  ;;  %s157_s25 = scalar_select %p156_p0, %s1971_s22, 0 }
  0x3b   :  { %345 = vmatpush.msra.mxu3 %v1976_v55  ;;  %s2647_s24 = smov (!%p1412_p13, %s150_s24), 15  ;;  %443 = vmatpush.msrb.mxu2 %v1851_v11 }
  0x3c   :  { %346 = vmatmul.f32.vlgmr.msra.gmra.mxu3 %v1754_v0  ;;  %362 = vmatpush.msrb.mxu0 %v1982_v58  ;;  %s153_s26 = scalar_lea.vmem [#allocation6], %s2647_s24  ;;  %s2649_s25 = smov (!%p1418_p1, %s157_s25), 15 }
  0x3d   :  { %458 = vmatpush.msrb.mxu3 %v1837_v8  ;;  %380 = vmatpush.msrb.mxu1 %v2007_v13  ;;  %v154_v29 = vld [vmem:[%s153_s26] sm:$0x1]  ;;  %s160_s27 = scalar_lea.vmem [#allocation6], %s2649_s25 }
  0x3e   :  { %363 = vmatpush.msrb.mxu0 %v1991_v62  ;;  %v178_v40 = vrot.slane %v154_v29, 2  ;;  %v161_v43 = vld [vmem:[%s160_s27] sm:$0x1]  ;;  %444 = vmatpush.msrb.mxu2 %v1859_v14 }
  0x3f   :  { %459 = vmatpush.msrb.mxu3 %v1846_v10  ;;  %381 = vmatpush.msrb.mxu1 %v2019_v21  ;;  %v181_v46 = vrot.slane %v161_v43, 1 }
  0x40   :  { %364 = vmatpush.msrb.mxu0 %v2000_v4  ;;  %v194_v45 = vsel %vm193_vm5, %v192_v33, %v178_v40  ;;  %445 = vmatpush.msrb.mxu2 %v1873_v17 }
  0x41   :  { %460 = vmatpush.msrb.mxu3 %v1855_v12  ;;  %382 = vmatpush.msrb.mxu1 %v2028_v37  ;;  %v196_v49 = vsel %vm195_vm6, %v194_v45, %v181_v46 }
  0x42   :  { %365 = vmatpush.msrb.mxu0 %v2013_v19  ;;  %1424 = vmatmul.msk.f32.vlgmr.msra.gmra.mxu1 %vm217_vm7, %v196_v49 }
  0x43   :  { %461 = vmatpush.msrb.mxu3 %v1866_v16  ;;  %383 = vmatpush.msrb.mxu1 %v2033_v41 }
  0x44   :  { %1423 = vmatmul.msk.f32.vlgmr.msra.gmra.mxu0 %vm217_vm7, %v196_v49  ;;  %1425 = vmatmul.msk.f32.vlgmr.msra.gmra.mxu2 %vm217_vm7, %v196_v49 }
  0x45   :  { %462 = vmatpush.msrb.mxu3 %v1877_v18  ;;  %384 = vmatpush.msrb.mxu1 %v2041_v47 }
  0x46   :  { %478 = vmatpush.msra.mxu0 %v1889_v23  ;;  %446 = vmatpush.msrb.mxu2 %v1881_v20 }
  0x47   :  { %463 = vmatpush.msrb.mxu3 %v1885_v22  ;;  %385 = vmatpush.msrb.mxu1 %v2046_v52 }
  0x48   :  { %479 = vmatpush.msra.mxu0 %v1896_v25  ;;  %447 = vmatpush.msrb.mxu2 %v1892_v24 }
  0x49   :  { %464 = vmatpush.msrb.mxu3 %v1899_v26  ;;  %561 = vmatpush.msra.mxu1 %v1816_v1 }
  0x4a   :  { %480 = vmatpush.msra.mxu0 %v1920_v31  ;;  %386 = vmatmul.f32.vlgmr.msrb.gmra.mxu1 %v1754_v0 }
  0x4b   :  { %465 = vmatpush.msrb.mxu3 %v1908_v28  ;;  %562 = vmatpush.msra.mxu1 %v1821_v3 }
  0x4c   :  { %366 = vmatmul.f32.vlgmr.msrb.gmra.mxu0 %v1754_v0  ;;  %448 = vmatpush.msrb.mxu2 %v1904_v27 }
  0x4d   :  { %466 = vmatpush.msrb.mxu3 %v1923_v32  ;;  %481 = vmatpush.msra.mxu0 %v1927_v34 }
  0x4e   :  { %563 = vmatpush.msra.mxu1 %v1825_v5  ;;  %449 = vmatpush.msrb.mxu2 %v1917_v30 }
  0x4f   :  { %467 = vmatpush.msrb.mxu3 %v1932_v36  ;;  %482 = vmatpush.msra.mxu0 %v1936_v38 }
  0x50   :  { %564 = vmatpush.msra.mxu1 %v1832_v7  ;;  %450 = vmatpush.msrb.mxu2 %v1930_v35 }
  0x51   :  { %468 = vmatpush.msrb.mxu3 %v1948_v42  ;;  %483 = vmatpush.msra.mxu0 %v1953_v44 }
  0x52   :  { %565 = vmatpush.msra.mxu1 %v1841_v9  ;;  %451 = vmatpush.msrb.mxu2 %v1939_v39 }
  0x53   :  { %469 = vmatpush.msrb.mxu3 %v1969_v51  ;;  %484 = vmatpush.msra.mxu0 %v1966_v50 }
  0x54   :  { %566 = vmatpush.msra.mxu1 %v1851_v11  ;;  %452 = vmatpush.msrb.mxu2 %v1961_v48 }
  0x55   :  { %470 = vmatpush.msrb.mxu3 %v1982_v58  ;;  %485 = vmatpush.msra.mxu0 %v1978_v56 }
  0x56   :  { %567 = vmatpush.msra.mxu1 %v1859_v14  ;;  %453 = vmatpush.msrb.mxu2 %v1976_v55 }
  0x57   :  { %471 = vmatpush.msrb.mxu3 %v1991_v62  ;;  %486 = vmatpush.msra.mxu0 %v1986_v59 }
  0x58   :  { %568 = vmatpush.msra.mxu1 %v1873_v17  ;;  %581 = vmatpush.msra.mxu2 %v1837_v8 }
  0x59   :  { %472 = vmatpush.msrb.mxu3 %v2000_v4  ;;  %487 = vmatpush.msra.mxu0 %v1997_v2 }
  0x5a   :  { %582 = vmatpush.msra.mxu2 %v1846_v10  ;;  %569 = vmatpush.msra.mxu1 %v1881_v20 }
  0x5b   :  { %473 = vmatpush.msrb.mxu3 %v2013_v19  ;;  %488 = vmatpush.msra.mxu0 %v2007_v13 }
  0x5c   :  { %583 = vmatpush.msra.mxu2 %v1855_v12  ;;  %570 = vmatpush.msra.mxu1 %v1892_v24 }
  0x5d   :  { %601 = vmatpush.msra.mxu3 %v1889_v23  ;;  %489 = vmatpush.msra.mxu0 %v2019_v21 }
  0x5e   :  { %584 = vmatpush.msra.mxu2 %v1866_v16  ;;  %571 = vmatpush.msra.mxu1 %v1904_v27 }
  0x5f   :  { %602 = vmatpush.msra.mxu3 %v1896_v25  ;;  %490 = vmatpush.msra.mxu0 %v2028_v37 }
  0x60   :  { %585 = vmatpush.msra.mxu2 %v1877_v18  ;;  %572 = vmatpush.msra.mxu1 %v1917_v30 }
  0x61   :  { %603 = vmatpush.msra.mxu3 %v1920_v31  ;;  %491 = vmatpush.msra.mxu0 %v2033_v41 }
  0x62   :  { %586 = vmatpush.msra.mxu2 %v1885_v22  ;;  %573 = vmatpush.msra.mxu1 %v1930_v35 }
  0x63   :  { %604 = vmatpush.msra.mxu3 %v1927_v34  ;;  %492 = vmatpush.msra.mxu0 %v2041_v47 }
  0x64   :  { %587 = vmatpush.msra.mxu2 %v1899_v26  ;;  %574 = vmatpush.msra.mxu1 %v1939_v39 }
  0x65   :  { %605 = vmatpush.msra.mxu3 %v1936_v38  ;;  %493 = vmatpush.msra.mxu0 %v2046_v52 }
  0x66   :  { %588 = vmatpush.msra.mxu2 %v1908_v28  ;;  %575 = vmatpush.msra.mxu1 %v1961_v48 }
  0x67   :  { %606 = vmatpush.msra.mxu3 %v1953_v44  ;;  %683 = vmatpush.msrb.mxu0 %v1816_v1 }
  0x68   :  { %589 = vmatpush.msra.mxu2 %v1923_v32  ;;  %576 = vmatpush.msra.mxu1 %v1976_v55 }
  0x69   :  { %607 = vmatpush.msra.mxu3 %v1966_v50  ;;  %684 = vmatpush.msrb.mxu0 %v1821_v3 }
  0x6a   :  { %703 = vmatpush.msrb.mxu1 %v1837_v8  ;;  %590 = vmatpush.msra.mxu2 %v1932_v36 }
  0x6b   :  { %608 = vmatpush.msra.mxu3 %v1978_v56  ;;  %685 = vmatpush.msrb.mxu0 %v1825_v5 }
  0x6c   :  { %704 = vmatpush.msrb.mxu1 %v1846_v10  ;;  %591 = vmatpush.msra.mxu2 %v1948_v42 }
  0x6d   :  { %609 = vmatpush.msra.mxu3 %v1986_v59  ;;  %686 = vmatpush.msrb.mxu0 %v1832_v7 }
  0x6e   :  { %705 = vmatpush.msrb.mxu1 %v1855_v12  ;;  %592 = vmatpush.msra.mxu2 %v1969_v51 }
  0x6f   :  { %610 = vmatpush.msra.mxu3 %v1997_v2  ;;  %687 = vmatpush.msrb.mxu0 %v1841_v9 }
  0x70   :  { %706 = vmatpush.msrb.mxu1 %v1866_v16  ;;  %593 = vmatpush.msra.mxu2 %v1982_v58 }
  0x71   :  { %611 = vmatpush.msra.mxu3 %v2007_v13  ;;  %688 = vmatpush.msrb.mxu0 %v1851_v11 }
  0x72   :  { %707 = vmatpush.msrb.mxu1 %v1877_v18  ;;  %594 = vmatpush.msra.mxu2 %v1991_v62 }
  0x73   :  { %612 = vmatpush.msra.mxu3 %v2019_v21  ;;  %689 = vmatpush.msrb.mxu0 %v1859_v14 }
  0x74   :  { %708 = vmatpush.msrb.mxu1 %v1885_v22  ;;  %595 = vmatpush.msra.mxu2 %v2000_v4 }
  0x75   :  { %613 = vmatpush.msra.mxu3 %v2028_v37  ;;  %690 = vmatpush.msrb.mxu0 %v1873_v17 }
  0x76   :  { %709 = vmatpush.msrb.mxu1 %v1899_v26  ;;  %596 = vmatpush.msra.mxu2 %v2013_v19 }
  0x77   :  { %614 = vmatpush.msra.mxu3 %v2033_v41  ;;  %691 = vmatpush.msrb.mxu0 %v1881_v20 }
  0x78   :  { %710 = vmatpush.msrb.mxu1 %v1908_v28 }
  0x79   :  { %615 = vmatpush.msra.mxu3 %v2041_v47  ;;  %692 = vmatpush.msrb.mxu0 %v1892_v24 }
  0x7a   :  { %711 = vmatpush.msrb.mxu1 %v1923_v32 }
  0x7b   :  { %616 = vmatpush.msra.mxu3 %v2046_v52  ;;  %693 = vmatpush.msrb.mxu0 %v1904_v27 }
  0x7c   :  { %712 = vmatpush.msrb.mxu1 %v1932_v36 }
  0x7d   :  { %694 = vmatpush.msrb.mxu0 %v1917_v30 }
  0x7e   :  { %713 = vmatpush.msrb.mxu1 %v1948_v42 }
  0x7f   :  { %695 = vmatpush.msrb.mxu0 %v1930_v35 }
  0x80   :  { %714 = vmatpush.msrb.mxu1 %v1969_v51 }
  0x81   :  { %696 = vmatpush.msrb.mxu0 %v1939_v39 }
  0x82   :  { %715 = vmatpush.msrb.mxu1 %v1982_v58 }
  0x83   :  { %697 = vmatpush.msrb.mxu0 %v1961_v48 }
  0x84   :  { %716 = vmatpush.msrb.mxu1 %v1991_v62 }
  0x85   :  { %698 = vmatpush.msrb.mxu0 %v1976_v55 }
  0x86   :  { %717 = vmatpush.msrb.mxu1 %v2000_v4 }
  0x88   :  { %718 = vmatpush.msrb.mxu1 %v2013_v19 }
  0xbf   :  { %v347_v60 = vpop.f32.mrf.mxu3  ;;  %v258_v0 = vpop.f32.mrf.mxu1 }
  0xc0   :  { %v2174_v15 = vadd.f32 %v258_v0, %v212_v63 }
  0xc1   :  { %v238_v57 = vpop.f32.mrf.mxu0 }
  0xc2   :  { %v2171_v61 = vadd.f32 %v238_v57, %v211_v54  ;;  %2611 = vst [vmem:[#allocation27_spill] sm:$0xff] %v2174_v15 }
  0xc4   :  { %2610 = vst [vmem:[#allocation26_spill] sm:$0xff] %v2171_v61  ;;  %v390_v6 = vadd.f32 %v347_v60, %v2171_v61  ;;  %v2180_v60 = vld [vmem:[%s2576_s5] sm:$0x1] }
  0xc5   :  { %2612 = vst [vmem:[#allocation28_spill] sm:$0xff] %v2180_v60 }
  0xc6   :  { %v1426_v29 = vmul.f32 -1.442695, %v390_v6 }
  0xc7   :  { %v387_v63 = vpop.f32.mrf.mxu1 }
  0xc8   :  { %1470 = vpow2.f32 %v1426_v29 }
  0xc9   :  { %v367_v33 = vpop.f32.mrf.mxu0 }
  0xca   :  { %v410_v40 = vadd.f32 %v367_v33, %v2174_v15  ;;  %v213_v33 = vperm.slane %v209_v53, 2 }
  0xcc   :  { %v1427_v43 = vmul.f32 -1.442695, %v410_v40 }
  0xce   :  { %v1471_v45 = vpop.eup %1470  ;;  %1472 = vpow2.f32 %v1427_v43  ;;  %v278_v43 = vpop.f32.mrf.mxu2 }
  0xcf   :  { %v394_v46 = vadd.f32 1.0, %v1471_v45  ;;  %v2183_v4 = vadd.f32 %v278_v43, %v213_v33 }
  0xd1   :  { %1474 = vrcp.f32 %v394_v46  ;;  %v406_v0 = vand.u32 2147483648, %v394_v46  ;;  %v404_v29 = vand.u32 2147483647, %v394_v46  ;;  %vm400_vm9 = vweird.f32 %v394_v46 }
  0xd3   :  { %vm405_vm11 = vcmp.eq.f32.partialorder %v404_v29, 8.507059e+37 }
  0xd4   :  { %v1473_v49 = vpop.eup %1472 }
  0xd5   :  { %v414_v19 = vadd.f32 1.0, %v1473_v49  ;;  %v430_v49 = vadd.f32 %v387_v63, %v2180_v60 }
  0xd7   :  { %v1475_v54 = vpop.eup %1474  ;;  %1476 = vrcp.f32 %v414_v19  ;;  %vm420_vm12 = vweird.f32 %v414_v19  ;;  %v426_v47 = vand.u32 2147483648, %v414_v19  ;;  %v424_v62 = vand.u32 2147483647, %v414_v19 }
  0xd8   :  { %v396_v57 = vmul.f32 %v1475_v54, %v394_v46  ;;  %vm401_vm8 = vweird.f32 %v1475_v54 }
  0xd9   :  { %vm402_vm10 = vmor %vm400_vm9, %vm401_vm8  ;;  %v427_v46 = vor.u32 1.1754944e-38, %v426_v47  ;;  %vm425_vm15 = vcmp.eq.f32.partialorder %v424_v62, 8.507059e+37  ;;  %v2615_v62 = vld [vmem:[#allocation24_spill] sm:$0xff]  ;;  %v2617_v47 = vld [vmem:[#allocation22_spill] sm:$0xff] }
  0xda   :  { %v397_v55 = vsub.f32 1.0, %v396_v57  ;;  %v407_v57 = vor.u32 1.1754944e-38, %v406_v0 }
  0xdc   :  { %v398_v6 = vmul.f32 %v1475_v54, %v397_v55 }
  0xdd   :  { %v1477_v40 = vpop.eup %1476 }
  0xde   :  { %v416_v45 = vmul.f32 %v1477_v40, %v414_v19  ;;  %v399_v15 = vadd.f32 %v1475_v54, %v398_v6  ;;  %vm421_vm13 = vweird.f32 %v1477_v40  ;;  %v2616_v19 = vld [vmem:[#allocation19_spill] sm:$0xff] }
  0xdf   :  { %vm422_vm14 = vmor %vm420_vm12, %vm421_vm13 }
  0xe0   :  { %v417_v61 = vsub.f32 1.0, %v416_v45  ;;  %v403_v52 = vsel %vm402_vm10, %v1475_v54, %v399_v15 }
  0xe1   :  { %v408_v48 = vsel %vm405_vm11, %v407_v57, %v403_v52  ;;  %v2618_v52 = vld [vmem:[#allocation25_spill] sm:$0xff] }
  0xe2   :  { %v418_v55 = vmul.f32 %v1477_v40, %v417_v61  ;;  %v431_v53 = vmul.f32 %v430_v49, %v408_v48  ;;  %v2614_v48 = vld [vmem:[#allocation21_spill] sm:$0xff]  ;;  %v2619_v61 = vld [vmem:[#allocation20_spill] sm:$0xff] }
  0xe4   :  { %v419_v39 = vadd.f32 %v1477_v40, %v418_v55  ;;  %v432_v6 = vadd.f32 %v431_v53, %v2183_v4  ;;  %v2621_v53 = vld [vmem:[#allocation26_spill] sm:$0xff] }
  0xe6   :  { %v423_v63 = vsel %vm422_vm14, %v1477_v40, %v419_v39  ;;  %1478 = vtanh.f32 %v432_v6  ;;  %v2613_v39 = vld [vmem:[#allocation18_spill] sm:$0xff]  ;;  %v2620_v40 = vld [vmem:[#allocation23_spill] sm:$0xff] }
  0xe7   :  { %v428_v0 = vsel %vm425_vm15, %v427_v46, %v423_v63  ;;  %v2622_v46 = vld [vmem:[#allocation27_spill] sm:$0xff] }
  0xe8   :  { %v434_v15 = vsub.f32 1.0, %v428_v0  ;;  %v436_v33 = vmul.f32 0.0, %v428_v0 }
  0xec   :  { %v1479_v54 = vpop.eup %1478 }
  0xed   :  { %v435_v29 = vmul.f32 %v1479_v54, %v434_v15 }
  0xef   :  { %v2186_v43 = vadd.f32 %v436_v33, %v435_v29 }
  0xf1   :  { %454 = vmatmul.f32.vlgmr.msrb.gmra.mxu2 %v2186_v43  ;;  %474 = vmatmul.f32.vlgmr.msrb.gmra.mxu3 %v2186_v43 }
  0xf2   :  { %494 = vmatmul.f32.vlgmr.msra.gmra.mxu0 %v2186_v43  ;;  %723 = vmatpush.msrb.mxu2 %v1889_v23 }
  0xf3   :  { %805 = vmatpush.msrb.mxu3 %v1816_v1  ;;  %825 = vmatpush.msra.mxu0 %v1837_v8 }
  0xf4   :  { %724 = vmatpush.msrb.mxu2 %v1896_v25 }
  0xf5   :  { %806 = vmatpush.msrb.mxu3 %v1821_v3  ;;  %826 = vmatpush.msra.mxu0 %v1846_v10 }
  0xf6   :  { %725 = vmatpush.msrb.mxu2 %v1920_v31 }
  0xf7   :  { %807 = vmatpush.msrb.mxu3 %v1825_v5  ;;  %827 = vmatpush.msra.mxu0 %v1855_v12 }
  0xf8   :  { %726 = vmatpush.msrb.mxu2 %v1927_v34 }
  0xf9   :  { %808 = vmatpush.msrb.mxu3 %v1832_v7  ;;  %828 = vmatpush.msra.mxu0 %v1866_v16 }
  0xfa   :  { %727 = vmatpush.msrb.mxu2 %v1936_v38 }
  0xfb   :  { %809 = vmatpush.msrb.mxu3 %v1841_v9  ;;  %829 = vmatpush.msra.mxu0 %v1877_v18 }
  0xfc   :  { %728 = vmatpush.msrb.mxu2 %v1953_v44 }
  0xfd   :  { %810 = vmatpush.msrb.mxu3 %v1851_v11  ;;  %830 = vmatpush.msra.mxu0 %v1885_v22 }
  0xfe   :  { %729 = vmatpush.msrb.mxu2 %v1966_v50 }
  0xff   :  { %811 = vmatpush.msrb.mxu3 %v1859_v14  ;;  %831 = vmatpush.msra.mxu0 %v1899_v26 }
 0x100   :  { %730 = vmatpush.msrb.mxu2 %v1978_v56 }
 0x101   :  { %812 = vmatpush.msrb.mxu3 %v1873_v17  ;;  %832 = vmatpush.msra.mxu0 %v1908_v28 }
 0x102   :  { %731 = vmatpush.msrb.mxu2 %v1986_v59 }
 0x103   :  { %813 = vmatpush.msrb.mxu3 %v1881_v20  ;;  %833 = vmatpush.msra.mxu0 %v1923_v32 }
 0x104   :  { %732 = vmatpush.msrb.mxu2 %v1997_v2 }
 0x105   :  { %814 = vmatpush.msrb.mxu3 %v1892_v24  ;;  %834 = vmatpush.msra.mxu0 %v1932_v36 }
 0x106   :  { %733 = vmatpush.msrb.mxu2 %v2007_v13 }
 0x107   :  { %815 = vmatpush.msrb.mxu3 %v1904_v27  ;;  %835 = vmatpush.msra.mxu0 %v1948_v42 }
 0x108   :  { %734 = vmatpush.msrb.mxu2 %v2019_v21 }
 0x109   :  { %816 = vmatpush.msrb.mxu3 %v1917_v30  ;;  %836 = vmatpush.msra.mxu0 %v1969_v51 }
 0x10a   :  { %735 = vmatpush.msrb.mxu2 %v2028_v37 }
 0x10b   :  { %817 = vmatpush.msrb.mxu3 %v1930_v35  ;;  %837 = vmatpush.msra.mxu0 %v1982_v58 }
 0x10c   :  { %736 = vmatpush.msrb.mxu2 %v2033_v41 }
 0x10d   :  { %818 = vmatpush.msrb.mxu3 %v2613_v39  ;;  %838 = vmatpush.msra.mxu0 %v2614_v48 }
 0x10e   :  { %737 = vmatpush.msrb.mxu2 %v2615_v62 }
 0x10f   :  { %819 = vmatpush.msrb.mxu3 %v2616_v19  ;;  %839 = vmatpush.msra.mxu0 %v2617_v47 }
 0x110   :  { %738 = vmatpush.msrb.mxu2 %v2618_v52 }
 0x111   :  { %820 = vmatpush.msrb.mxu3 %v2619_v61  ;;  %840 = vmatpush.msra.mxu0 %v2620_v40 }
 0x16f   :  { %v495_v19 = vpop.f32.mrf.mxu0 }
 0x174   :  { %v455_v45 = vpop.f32.mrf.mxu2  ;;  %v475_v49 = vpop.f32.mrf.mxu3 }
 0x175   :  { %v499_v57 = vrot.slane %v455_v45, 7  ;;  %v522_v55 = vrot.slane %v475_v49, 7 }
 0x177   :  { %v501_v6 = vadd.f32 %v499_v57, %v2621_v53  ;;  %v524_v63 = vadd.f32 %v522_v55, %v2622_v46  ;;  %v544_v55 = vadd.f32 %v495_v19, %v2180_v60 }
 0x179   :  { %v1428_v0 = vmul.f32 -1.442695, %v501_v6  ;;  %v1429_v15 = vmul.f32 -1.442695, %v524_v63 }
 0x17b   :  { %1480 = vpow2.f32 %v1428_v0 }
 0x17c   :  { %1482 = vpow2.f32 %v1429_v15 }
 0x181   :  { %v1481_v54 = vpop.eup %1480 }
 0x182   :  { %v1483_v29 = vpop.eup %1482  ;;  %v505_v33 = vadd.f32 1.0, %v1481_v54 }
 0x183   :  { %v528_v52 = vadd.f32 1.0, %v1483_v29  ;;  %v546_v29 = vrot.slane %v544_v55, 7 }
 0x184   :  { %1484 = vrcp.f32 %v505_v33  ;;  %v517_v62 = vand.u32 2147483648, %v505_v33  ;;  %v515_v63 = vand.u32 2147483647, %v505_v33  ;;  %vm511_vm8 = vweird.f32 %v505_v33 }
 0x185   :  { %1486 = vrcp.f32 %v528_v52  ;;  %vm534_vm12 = vweird.f32 %v528_v52 }
 0x186   :  { %v518_v54 = vor.u32 1.1754944e-38, %v517_v62  ;;  %vm516_vm10 = vcmp.eq.f32.partialorder %v515_v63, 8.507059e+37  ;;  %v554_v62 = vrot.slane %v2186_v43, 7 }
 0x18a   :  { %v1485_v61 = vpop.eup %1484 }
 0x18b   :  { %v1487_v40 = vpop.eup %1486  ;;  %v507_v47 = vmul.f32 %v1485_v61, %v505_v33  ;;  %vm512_vm7 = vweird.f32 %v1485_v61 }
 0x18c   :  { %v530_v45 = vmul.f32 %v1487_v40, %v528_v52  ;;  %vm513_vm9 = vmor %vm511_vm8, %vm512_vm7  ;;  %vm535_vm11 = vweird.f32 %v1487_v40 }
 0x18d   :  { %v508_v49 = vsub.f32 1.0, %v507_v47  ;;  %v540_v47 = vand.u32 2147483648, %v528_v52  ;;  %vm536_vm13 = vmor %vm534_vm12, %vm535_vm11 }
 0x18e   :  { %v531_v57 = vsub.f32 1.0, %v530_v45  ;;  %v538_v45 = vand.u32 2147483647, %v528_v52 }
 0x18f   :  { %v509_v6 = vmul.f32 %v1485_v61, %v508_v49  ;;  %v541_v60 = vor.u32 1.1754944e-38, %v540_v47 }
 0x190   :  { %v532_v0 = vmul.f32 %v1487_v40, %v531_v57  ;;  %vm539_vm14 = vcmp.eq.f32.partialorder %v538_v45, 8.507059e+37 }
 0x191   :  { %v510_v15 = vadd.f32 %v1485_v61, %v509_v6 }
 0x192   :  { %v533_v48 = vadd.f32 %v1487_v40, %v532_v0 }
 0x193   :  { %v514_v46 = vsel %vm513_vm9, %v1485_v61, %v510_v15 }
 0x194   :  { %v519_v53 = vsel %vm516_vm10, %v518_v54, %v514_v46  ;;  %v537_v49 = vsel %vm536_vm13, %v1487_v40, %v533_v48 }
 0x195   :  { %v548_v39 = vmul.f32 %v546_v29, %v519_v53  ;;  %v542_v33 = vsel %vm539_vm14, %v541_v60, %v537_v49 }
 0x196   :  { %v551_v57 = vsub.f32 1.0, %v542_v33  ;;  %v556_v46 = vmul.f32 %v554_v62, %v542_v33 }
 0x197   :  { %v549_v19 = vadd.f32 %v548_v39, %v2183_v4 }
 0x199   :  { %1488 = vtanh.f32 %v549_v19 }
 0x19f   :  { %v1489_v61 = vpop.eup %1488 }
 0x1a0   :  { %v552_v55 = vmul.f32 %v1489_v61, %v551_v57 }
 0x1a2   :  { %v2244_v6 = vadd.f32 %v556_v46, %v552_v55 }
 0x1a4   :  { %v559_v53 = vrot.slane %v2244_v6, 1  ;;  %v676_v61 = vrot.slane %v2244_v6, 7 }
 0x1a6   :  { %577 = vmatmul.f32.vlgmr.msra.gmra.mxu1 %v559_v53  ;;  %597 = vmatmul.f32.vlgmr.msra.gmra.mxu2 %v559_v53 }
 0x1a7   :  { %617 = vmatmul.f32.vlgmr.msra.gmra.mxu3 %v559_v53  ;;  %845 = vmatpush.msra.mxu1 %v1889_v23  ;;  %v2632_v23 = vld [vmem:[#allocation27_spill] sm:$0xff] }
 0x1a8   :  { %927 = vmatpush.msra.mxu2 %v1816_v1  ;;  %947 = vmatpush.msra.mxu3 %v1837_v8  ;;  %v2623_v1 = vld [vmem:[#allocation18_spill] sm:$0xff] }
 0x1a9   :  { %846 = vmatpush.msra.mxu1 %v1896_v25  ;;  %v2627_v8 = vld [vmem:[#allocation22_spill] sm:$0xff] }
 0x1aa   :  { %928 = vmatpush.msra.mxu2 %v1821_v3  ;;  %948 = vmatpush.msra.mxu3 %v1846_v10  ;;  %v2624_v3 = vld [vmem:[#allocation21_spill] sm:$0xff]  ;;  %v2629_v10 = vld [vmem:[#allocation20_spill] sm:$0xff] }
 0x1ab   :  { %847 = vmatpush.msra.mxu1 %v1920_v31 }
 0x1ac   :  { %929 = vmatpush.msra.mxu2 %v1825_v5  ;;  %949 = vmatpush.msra.mxu3 %v1855_v12  ;;  %v2625_v5 = vld [vmem:[#allocation24_spill] sm:$0xff] }
 0x1ad   :  { %848 = vmatpush.msra.mxu1 %v1927_v34 }
 0x1ae   :  { %930 = vmatpush.msra.mxu2 %v1832_v7  ;;  %950 = vmatpush.msra.mxu3 %v1866_v16  ;;  %v2626_v7 = vld [vmem:[#allocation19_spill] sm:$0xff]  ;;  %v2631_v16 = vld [vmem:[#allocation26_spill] sm:$0xff] }
 0x1af   :  { %849 = vmatpush.msra.mxu1 %v1936_v38 }
 0x1b0   :  { %931 = vmatpush.msra.mxu2 %v1841_v9  ;;  %951 = vmatpush.msra.mxu3 %v1877_v18  ;;  %v2628_v9 = vld [vmem:[#allocation25_spill] sm:$0xff] }
 0x1b1   :  { %850 = vmatpush.msra.mxu1 %v1953_v44  ;;  %v2633_v44 = vld [vmem:[#allocation28_spill] sm:$0xff] }
 0x1b2   :  { %932 = vmatpush.msra.mxu2 %v1851_v11  ;;  %952 = vmatpush.msra.mxu3 %v1885_v22  ;;  %v2630_v11 = vld [vmem:[#allocation23_spill] sm:$0xff] }
 0x1b3   :  { %851 = vmatpush.msra.mxu1 %v1966_v50 }
 0x1b4   :  { %933 = vmatpush.msra.mxu2 %v1859_v14  ;;  %953 = vmatpush.msra.mxu3 %v1899_v26 }
 0x1b5   :  { %852 = vmatpush.msra.mxu1 %v1978_v56 }
 0x1b6   :  { %934 = vmatpush.msra.mxu2 %v1873_v17  ;;  %954 = vmatpush.msra.mxu3 %v1908_v28 }
 0x1b7   :  { %853 = vmatpush.msra.mxu1 %v1986_v59 }
 0x1b8   :  { %935 = vmatpush.msra.mxu2 %v1881_v20  ;;  %955 = vmatpush.msra.mxu3 %v1923_v32 }
 0x1b9   :  { %854 = vmatpush.msra.mxu1 %v1997_v2 }
 0x1ba   :  { %936 = vmatpush.msra.mxu2 %v1892_v24  ;;  %956 = vmatpush.msra.mxu3 %v1932_v36 }
 0x1bb   :  { %855 = vmatpush.msra.mxu1 %v2007_v13 }
 0x1bc   :  { %937 = vmatpush.msra.mxu2 %v1904_v27  ;;  %957 = vmatpush.msra.mxu3 %v1948_v42 }
 0x1bd   :  { %856 = vmatpush.msra.mxu1 %v2019_v21 }
 0x1be   :  { %938 = vmatpush.msra.mxu2 %v1917_v30  ;;  %958 = vmatpush.msra.mxu3 %v1969_v51 }
 0x1bf   :  { %857 = vmatpush.msra.mxu1 %v2028_v37 }
 0x1c0   :  { %939 = vmatpush.msra.mxu2 %v1930_v35  ;;  %959 = vmatpush.msra.mxu3 %v1982_v58 }
 0x1c1   :  { %858 = vmatpush.msra.mxu1 %v2033_v41 }
 0x1c2   :  { %940 = vmatpush.msra.mxu2 %v2623_v1  ;;  %960 = vmatpush.msra.mxu3 %v2624_v3 }
 0x1c3   :  { %859 = vmatpush.msra.mxu1 %v2625_v5 }
 0x1c4   :  { %941 = vmatpush.msra.mxu2 %v2626_v7  ;;  %961 = vmatpush.msra.mxu3 %v2627_v8  ;;  %v1290_v7 = vsel %vm183_vm0, %v2186_v43, %v2244_v6  ;;  %v2319_v43 = vld [vmem:[#allocation9 + $0x160] sm:$0xff]  ;;  %v2322_v6 = vld [vmem:[#allocation9 + $0x150] sm:$0xff] }
 0x1c5   :  { %860 = vmatpush.msra.mxu1 %v2628_v9 }
 0x1c6   :  { %942 = vmatpush.msra.mxu2 %v2629_v10  ;;  %962 = vmatpush.msra.mxu3 %v2630_v11 }
 0x223   :  { %v578_v12 = vpop.f32.mrf.mxu1 }
 0x224   :  { %v622_v14 = vrot.slane %v578_v12, 6 }
 0x226   :  { %v624_v17 = vadd.f32 %v622_v14, %v2631_v16  ;;  %v2310_v14 = vld [vmem:[#allocation9 + $0x178] sm:$0xff] }
 0x228   :  { %v1430_v18 = vmul.f32 -1.442695, %v624_v17  ;;  %v2313_v17 = vld [vmem:[#allocation9 + $0x168] sm:$0xff] }
 0x229   :  { %v598_v20 = vpop.f32.mrf.mxu2 }
 0x22a   :  { %1490 = vpow2.f32 %v1430_v18  ;;  %v645_v22 = vrot.slane %v598_v20, 6  ;;  %v618_v34 = vpop.f32.mrf.mxu3  ;;  %v2316_v18 = vld [vmem:[#allocation9 + $0x170] sm:$0xff]  ;;  %v2325_v20 = vld [vmem:[#allocation9 + $0x158] sm:$0xff] }
 0x22b   :  { %v667_v51 = vadd.f32 %v618_v34, %v2633_v44  ;;  %v2355_v34 = vld [vmem:[#allocation9 + $0x100] sm:$0xff] }
 0x22c   :  { %v647_v24 = vadd.f32 %v645_v22, %v2632_v23  ;;  %v2328_v22 = vld [vmem:[#allocation9 + $0x148] sm:$0xff] }
 0x22d   :  { %v669_v63 = vrot.slane %v667_v51, 6  ;;  %v2372_v51 = vld [vmem:[#allocation9 + $0xc0] sm:$0xff] }
 0x22e   :  { %v1431_v25 = vmul.f32 -1.442695, %v647_v24  ;;  %v2331_v24 = vld [vmem:[#allocation9 + $0x138] sm:$0xff] }
 0x230   :  { %v1491_v26 = vpop.eup %1490  ;;  %1492 = vpow2.f32 %v1431_v25  ;;  %v2334_v25 = vld [vmem:[#allocation9 + $0x140] sm:$0xff] }
 0x231   :  { %v628_v27 = vadd.f32 1.0, %v1491_v26  ;;  %v2337_v26 = vld [vmem:[#allocation9 + $0x130] sm:$0xff] }
 0x233   :  { %1494 = vrcp.f32 %v628_v27  ;;  %v640_v36 = vand.u32 2147483648, %v628_v27  ;;  %v638_v42 = vand.u32 2147483647, %v628_v27  ;;  %vm634_vm7 = vweird.f32 %v628_v27 }
 0x235   :  { %v641_v48 = vor.u32 1.1754944e-38, %v640_v36  ;;  %vm639_vm9 = vcmp.eq.f32.partialorder %v638_v42, 8.507059e+37  ;;  %v2361_v36 = vld [vmem:[#allocation9 + $0xf8] sm:$0xff]  ;;  %v2368_v42 = vld [vmem:[#allocation9 + $0xe0] sm:$0xff] }
 0x236   :  { %v1493_v28 = vpop.eup %1492 }
 0x237   :  { %v651_v30 = vadd.f32 1.0, %v1493_v28  ;;  %v2343_v28 = vld [vmem:[#allocation9 + $0x128] sm:$0xff] }
 0x239   :  { %v1495_v31 = vpop.eup %1494  ;;  %1496 = vrcp.f32 %v651_v30  ;;  %v663_v54 = vand.u32 2147483648, %v651_v30  ;;  %v661_v47 = vand.u32 2147483647, %v651_v30  ;;  %vm657_vm11 = vweird.f32 %v651_v30 }
 0x23a   :  { %v630_v32 = vmul.f32 %v1495_v31, %v628_v27  ;;  %vm635_vm15 = vweird.f32 %v1495_v31  ;;  %v2340_v27 = vld [vmem:[#allocation9 + $0x120] sm:$0xff] }
 0x23b   :  { %vm636_vm8 = vmor %vm634_vm7, %vm635_vm15  ;;  %v664_v49 = vor.u32 1.1754944e-38, %v663_v54  ;;  %vm662_vm13 = vcmp.eq.f32.partialorder %v661_v47, 8.507059e+37 }
 0x23c   :  { %v631_v35 = vsub.f32 1.0, %v630_v32  ;;  %v2352_v32 = vld [vmem:[#allocation9 + $0x110] sm:$0xff] }
 0x23e   :  { %v632_v38 = vmul.f32 %v1495_v31, %v631_v35  ;;  %v2358_v35 = vld [vmem:[#allocation9 + $0xf0] sm:$0xff] }
 0x23f   :  { %v1497_v58 = vpop.eup %1496 }
 0x240   :  { %v653_v60 = vmul.f32 %v1497_v58, %v651_v30  ;;  %v633_v39 = vadd.f32 %v1495_v31, %v632_v38  ;;  %vm658_vm10 = vweird.f32 %v1497_v58  ;;  %v2346_v30 = vld [vmem:[#allocation9 + $0x118] sm:$0xff] }
 0x241   :  { %vm659_vm12 = vmor %vm657_vm11, %vm658_vm10  ;;  %v2365_v38 = vld [vmem:[#allocation9 + $0xd8] sm:$0xff] }
 0x242   :  { %v654_v52 = vsub.f32 1.0, %v653_v60  ;;  %v637_v40 = vsel %vm636_vm8, %v1495_v31, %v633_v39  ;;  %v2349_v31 = vld [vmem:[#allocation9 + $0x108] sm:$0xff]  ;;  %v2382_v60 = vld [vmem:[#allocation9 + $0xb0] sm:$0xff]  ;;  %v2389_v39 = vld [vmem:[#allocation9 + $0x98] sm:$0xff] }
 0x243   :  { %v642_v0 = vsel %vm639_vm9, %v641_v48, %v637_v40  ;;  %v2396_v48 = vld [vmem:[#allocation9 + $0x80] sm:$0xff]  ;;  %v2410_v40 = vld [vmem:[#allocation9 + $0x50] sm:$0xff] }
 0x244   :  { %v655_v15 = vmul.f32 %v1497_v58, %v654_v52  ;;  %v671_v29 = vmul.f32 %v669_v63, %v642_v0  ;;  %v2403_v52 = vld [vmem:[#allocation9 + $0x68] sm:$0xff]  ;;  %v2419_v63 = vld [vmem:[#allocation9 + $0x18] sm:$0xff] }
 0x246   :  { %v656_v45 = vadd.f32 %v1497_v58, %v655_v15  ;;  %v672_v19 = vadd.f32 %v671_v29, %v2183_v4 }
 0x248   :  { %v660_v33 = vsel %vm659_vm12, %v1497_v58, %v656_v45  ;;  %1498 = vtanh.f32 %v672_v19  ;;  %v2375_v58 = vld [vmem:[#allocation9 + $0xc8] sm:$0xff] }
 0x249   :  { %v665_v57 = vsel %vm662_vm13, %v664_v49, %v660_v33 }
 0x24a   :  { %v674_v62 = vsub.f32 1.0, %v665_v57  ;;  %v678_v53 = vmul.f32 %v676_v61, %v665_v57 }
 0x24e   :  { %v1499_v55 = vpop.eup %1498 }
 0x24f   :  { %v675_v46 = vmul.f32 %v1499_v55, %v674_v62 }
 0x251   :  { %v2300_v1 = vadd.f32 %v678_v53, %v675_v46 }
 0x253   :  { %v681_v10 = vrot.slane %v2300_v1, 2  ;;  %v2308_v12 = vsel %vm185_vm1, %v1290_v7, %v2300_v1 }
 0x255   :  { %699 = vmatmul.f32.vlgmr.msrb.gmra.mxu0 %v681_v10  ;;  %719 = vmatmul.f32.vlgmr.msrb.gmra.mxu1 %v681_v10 }
 0x256   :  { %739 = vmatmul.f32.vlgmr.msrb.gmra.mxu2 %v681_v10  ;;  %967 = vmatpush.msrb.mxu0 %v2310_v14 }
 0x257   :  { %1049 = vmatpush.msrb.mxu1 %v2313_v17  ;;  %1069 = vmatpush.msrb.mxu2 %v2316_v18 }
 0x258   :  { %968 = vmatpush.msrb.mxu0 %v2319_v43 }
 0x259   :  { %1050 = vmatpush.msrb.mxu1 %v2322_v6  ;;  %1070 = vmatpush.msrb.mxu2 %v2325_v20 }
 0x25a   :  { %969 = vmatpush.msrb.mxu0 %v2328_v22 }
 0x25b   :  { %1051 = vmatpush.msrb.mxu1 %v2331_v24  ;;  %1071 = vmatpush.msrb.mxu2 %v2334_v25 }
 0x25c   :  { %970 = vmatpush.msrb.mxu0 %v2337_v26 }
 0x25d   :  { %1052 = vmatpush.msrb.mxu1 %v2340_v27  ;;  %1072 = vmatpush.msrb.mxu2 %v2343_v28 }
 0x25e   :  { %971 = vmatpush.msrb.mxu0 %v2346_v30 }
 0x25f   :  { %1053 = vmatpush.msrb.mxu1 %v2349_v31  ;;  %1073 = vmatpush.msrb.mxu2 %v2352_v32 }
 0x260   :  { %972 = vmatpush.msrb.mxu0 %v2355_v34 }
 0x261   :  { %1054 = vmatpush.msrb.mxu1 %v2358_v35  ;;  %1074 = vmatpush.msrb.mxu2 %v2361_v36 }
 0x262   :  { %973 = vmatpush.msrb.mxu0 %v1966_v50  ;;  %v2379_v50 = vld [vmem:[#allocation9 + $0xa8] sm:$0xff] }
 0x263   :  { %1055 = vmatpush.msrb.mxu1 %v2365_v38  ;;  %1075 = vmatpush.msrb.mxu2 %v2368_v42 }
 0x264   :  { %974 = vmatpush.msrb.mxu0 %v1978_v56  ;;  %v2386_v56 = vld [vmem:[#allocation9 + $0x90] sm:$0xff] }
 0x265   :  { %1056 = vmatpush.msrb.mxu1 %v2372_v51  ;;  %1076 = vmatpush.msrb.mxu2 %v2375_v58 }
 0x266   :  { %975 = vmatpush.msrb.mxu0 %v1986_v59  ;;  %v2393_v59 = vld [vmem:[#allocation9 + $0x78] sm:$0xff] }
 0x267   :  { %1057 = vmatpush.msrb.mxu1 %v2379_v50  ;;  %1077 = vmatpush.msrb.mxu2 %v2382_v60 }
 0x268   :  { %976 = vmatpush.msrb.mxu0 %v1997_v2  ;;  %v2400_v2 = vld [vmem:[#allocation9 + $0x60] sm:$0xff] }
 0x269   :  { %1058 = vmatpush.msrb.mxu1 %v2386_v56  ;;  %1078 = vmatpush.msrb.mxu2 %v2389_v39 }
 0x26a   :  { %977 = vmatpush.msrb.mxu0 %v2007_v13  ;;  %v2407_v13 = vld [vmem:[#allocation9 + $0x48] sm:$0xff] }
 0x26b   :  { %1059 = vmatpush.msrb.mxu1 %v2393_v59  ;;  %1079 = vmatpush.msrb.mxu2 %v2396_v48 }
 0x26c   :  { %978 = vmatpush.msrb.mxu0 %v2019_v21  ;;  %v2414_v21 = vld [vmem:[#allocation9 + $0x30] sm:$0xff] }
 0x26d   :  { %1060 = vmatpush.msrb.mxu1 %v2400_v2  ;;  %1080 = vmatpush.msrb.mxu2 %v2403_v52 }
 0x26e   :  { %979 = vmatpush.msrb.mxu0 %v2028_v37  ;;  %v2424_v37 = vld [vmem:[#allocation9] sm:$0xff] }
 0x26f   :  { %1061 = vmatpush.msrb.mxu1 %v2407_v13  ;;  %1081 = vmatpush.msrb.mxu2 %v2410_v40 }
 0x270   :  { %980 = vmatpush.msrb.mxu0 %v2033_v41 }
 0x271   :  { %1062 = vmatpush.msrb.mxu1 %v2414_v21  ;;  %1082 = vmatpush.msrb.mxu2 %v2624_v3 }
 0x272   :  { %981 = vmatpush.msrb.mxu0 %v2625_v5 }
 0x273   :  { %1063 = vmatpush.msrb.mxu1 %v2419_v63  ;;  %1083 = vmatpush.msrb.mxu2 %v2627_v8 }
 0x274   :  { %982 = vmatpush.msrb.mxu0 %v2628_v9 }
 0x275   :  { %1064 = vmatpush.msrb.mxu1 %v2424_v37  ;;  %1084 = vmatpush.msrb.mxu2 %v2630_v11 }
 0x2d2   :  { %v700_v41 = vpop.f32.mrf.mxu0  ;;  %v720_v0 = vpop.f32.mrf.mxu1 }
 0x2d3   :  { %v744_v15 = vrot.slane %v700_v41, 5  ;;  %v767_v3 = vrot.slane %v720_v0, 5 }
 0x2d5   :  { %v746_v5 = vadd.f32 %v744_v15, %v2631_v16  ;;  %v769_v54 = vadd.f32 %v767_v3, %v2632_v23 }
 0x2d7   :  { %v1432_v29 = vmul.f32 -1.442695, %v746_v5  ;;  %v1433_v47 = vmul.f32 -1.442695, %v769_v54 }
 0x2d9   :  { %1500 = vpow2.f32 %v1432_v29  ;;  %v740_v62 = vpop.f32.mrf.mxu2 }
 0x2da   :  { %1502 = vpow2.f32 %v1433_v47  ;;  %v789_v10 = vadd.f32 %v740_v62, %v2633_v44 }
 0x2dc   :  { %v791_v5 = vrot.slane %v789_v10, 5 }
 0x2df   :  { %v1501_v8 = vpop.eup %1500 }
 0x2e0   :  { %v1503_v9 = vpop.eup %1502  ;;  %v750_v45 = vadd.f32 1.0, %v1501_v8 }
 0x2e1   :  { %v773_v19 = vadd.f32 1.0, %v1503_v9 }
 0x2e2   :  { %1504 = vrcp.f32 %v750_v45  ;;  %v762_v46 = vand.u32 2147483648, %v750_v45  ;;  %v760_v7 = vand.u32 2147483647, %v750_v45  ;;  %vm756_vm1 = vweird.f32 %v750_v45 }
 0x2e3   :  { %1506 = vrcp.f32 %v773_v19  ;;  %v785_v47 = vand.u32 2147483648, %v773_v19  ;;  %vm779_vm8 = vweird.f32 %v773_v19  ;;  %v783_v9 = vand.u32 2147483647, %v773_v19 }
 0x2e4   :  { %v763_v15 = vor.u32 1.1754944e-38, %v762_v46  ;;  %vm761_vm15 = vcmp.eq.f32.partialorder %v760_v7, 8.507059e+37 }
 0x2e5   :  { %v786_v62 = vor.u32 1.1754944e-38, %v785_v47  ;;  %vm784_vm10 = vcmp.eq.f32.partialorder %v783_v9, 8.507059e+37 }
 0x2e8   :  { %v1505_v49 = vpop.eup %1504 }
 0x2e9   :  { %v1507_v11 = vpop.eup %1506  ;;  %v752_v33 = vmul.f32 %v1505_v49, %v750_v45  ;;  %vm757_vm0 = vweird.f32 %v1505_v49 }
 0x2ea   :  { %v775_v57 = vmul.f32 %v1507_v11, %v773_v19  ;;  %vm758_vm14 = vmor %vm756_vm1, %vm757_vm0  ;;  %vm780_vm7 = vweird.f32 %v1507_v11 }
 0x2eb   :  { %v753_v61 = vsub.f32 1.0, %v752_v33  ;;  %vm781_vm9 = vmor %vm779_vm8, %vm780_vm7 }
 0x2ec   :  { %v776_v55 = vsub.f32 1.0, %v775_v57 }
 0x2ed   :  { %v754_v53 = vmul.f32 %v1505_v49, %v753_v61 }
 0x2ee   :  { %v777_v41 = vmul.f32 %v1507_v11, %v776_v55 }
 0x2ef   :  { %v755_v0 = vadd.f32 %v1505_v49, %v754_v53 }
 0x2f0   :  { %v778_v29 = vadd.f32 %v1507_v11, %v777_v41 }
 0x2f1   :  { %v759_v3 = vsel %vm758_vm14, %v1505_v49, %v755_v0  ;;  %v798_v49 = vrot.slane %v2300_v1, 7  ;;  %v2459_v1 = vld [vmem:[#allocation9 + $0xe8] sm:$0xff] }
 0x2f2   :  { %v764_v54 = vsel %vm761_vm15, %v763_v15, %v759_v3  ;;  %v782_v57 = vsel %vm781_vm9, %v1507_v11, %v778_v29 }
 0x2f3   :  { %v793_v8 = vmul.f32 %v791_v5, %v764_v54  ;;  %v787_v45 = vsel %vm784_vm10, %v786_v62, %v782_v57 }
 0x2f4   :  { %v796_v61 = vsub.f32 1.0, %v787_v45  ;;  %v800_v53 = vmul.f32 %v798_v49, %v787_v45 }
 0x2f5   :  { %v794_v33 = vadd.f32 %v793_v8, %v2183_v4 }
 0x2f7   :  { %1508 = vtanh.f32 %v794_v33 }
 0x2fd   :  { %v1509_v55 = vpop.eup %1508 }
 0x2fe   :  { %v797_v46 = vmul.f32 %v1509_v55, %v796_v61 }
 0x300   :  { %v2433_v7 = vadd.f32 %v800_v53, %v797_v46 }
 0x302   :  { %v803_v10 = vrot.slane %v2433_v7, 3  ;;  %v2439_v19 = vsel %vm187_vm2, %v2308_v12, %v2433_v7  ;;  %v2464_v12 = vld [vmem:[#allocation9 + $0xd0] sm:$0xff]  ;;  %v920_v53 = vrot.slane %v2433_v7, 7 }
 0x304   :  { %821 = vmatmul.f32.vlgmr.msrb.gmra.mxu3 %v803_v10  ;;  %841 = vmatmul.f32.vlgmr.msra.gmra.mxu0 %v803_v10 }
 0x305   :  { %861 = vmatmul.f32.vlgmr.msra.gmra.mxu1 %v803_v10  ;;  %1089 = vmatpush.msrb.mxu3 %v2310_v14 }
 0x306   :  { %1171 = vmatpush.msra.mxu0 %v2313_v17  ;;  %1191 = vmatpush.msra.mxu1 %v2316_v18  ;;  %v2469_v17 = vld [vmem:[#allocation9 + $0xb8] sm:$0xff]  ;;  %v2474_v18 = vld [vmem:[#allocation9 + $0xa0] sm:$0xff] }
 0x307   :  { %1090 = vmatpush.msrb.mxu3 %v2319_v43 }
 0x308   :  { %1172 = vmatpush.msra.mxu0 %v2322_v6  ;;  %1192 = vmatpush.msra.mxu1 %v2325_v20  ;;  %v2479_v6 = vld [vmem:[#allocation9 + $0x88] sm:$0xff]  ;;  %v2484_v20 = vld [vmem:[#allocation9 + $0x70] sm:$0xff] }
 0x309   :  { %1091 = vmatpush.msrb.mxu3 %v2328_v22 }
 0x30a   :  { %1173 = vmatpush.msra.mxu0 %v2331_v24  ;;  %1193 = vmatpush.msra.mxu1 %v2334_v25  ;;  %v2489_v24 = vld [vmem:[#allocation9 + $0x58] sm:$0xff]  ;;  %v2494_v25 = vld [vmem:[#allocation9 + $0x40] sm:$0xff] }
 0x30b   :  { %1092 = vmatpush.msrb.mxu3 %v2337_v26 }
 0x30c   :  { %1174 = vmatpush.msra.mxu0 %v2340_v27  ;;  %1194 = vmatpush.msra.mxu1 %v2343_v28  ;;  %v1597_v27 = vld [vmem:[#allocation9 + $0x38] sm:$0xff]  ;;  %v2498_v28 = vld [vmem:[#allocation9 + $0x28] sm:$0xff] }
 0x30d   :  { %1093 = vmatpush.msrb.mxu3 %v2346_v30 }
 0x30e   :  { %1175 = vmatpush.msra.mxu0 %v2349_v31  ;;  %1195 = vmatpush.msra.mxu1 %v2352_v32  ;;  %v1599_v31 = vld [vmem:[#allocation9 + $0x20] sm:$0xff]  ;;  %v2502_v32 = vld [vmem:[#allocation9 + $0x10] sm:$0xff] }
 0x30f   :  { %1094 = vmatpush.msrb.mxu3 %v2355_v34 }
 0x310   :  { %1176 = vmatpush.msra.mxu0 %v2358_v35  ;;  %1196 = vmatpush.msra.mxu1 %v2361_v36  ;;  %v1601_v35 = vld [vmem:[#allocation9 + $0x8] sm:$0xff] }
 0x311   :  { %1095 = vmatpush.msrb.mxu3 %v2459_v1 }
 0x312   :  { %1177 = vmatpush.msra.mxu0 %v2365_v38  ;;  %1197 = vmatpush.msra.mxu1 %v2368_v42 }
 0x313   :  { %1096 = vmatpush.msrb.mxu3 %v2464_v12 }
 0x314   :  { %1178 = vmatpush.msra.mxu0 %v2372_v51  ;;  %1198 = vmatpush.msra.mxu1 %v2375_v58 }
 0x315   :  { %1097 = vmatpush.msrb.mxu3 %v2469_v17 }
 0x316   :  { %1179 = vmatpush.msra.mxu0 %v2379_v50  ;;  %1199 = vmatpush.msra.mxu1 %v2382_v60 }
 0x317   :  { %1098 = vmatpush.msrb.mxu3 %v2474_v18 }
 0x318   :  { %1180 = vmatpush.msra.mxu0 %v2386_v56  ;;  %1200 = vmatpush.msra.mxu1 %v2389_v39 }
 0x319   :  { %1099 = vmatpush.msrb.mxu3 %v2479_v6 }
 0x31a   :  { %1181 = vmatpush.msra.mxu0 %v2393_v59  ;;  %1201 = vmatpush.msra.mxu1 %v2396_v48 }
 0x31b   :  { %1100 = vmatpush.msrb.mxu3 %v2484_v20 }
 0x31c   :  { %1182 = vmatpush.msra.mxu0 %v2400_v2  ;;  %1202 = vmatpush.msra.mxu1 %v2403_v52 }
 0x31d   :  { %1101 = vmatpush.msrb.mxu3 %v2489_v24 }
 0x31e   :  { %1183 = vmatpush.msra.mxu0 %v2407_v13  ;;  %1203 = vmatpush.msra.mxu1 %v2410_v40 }
 0x31f   :  { %1102 = vmatpush.msrb.mxu3 %v2494_v25 }
 0x320   :  { %1184 = vmatpush.msra.mxu0 %v2414_v21  ;;  %1204 = vmatpush.msra.mxu1 %v1597_v27 }
 0x321   :  { %1103 = vmatpush.msrb.mxu3 %v2498_v28 }
 0x322   :  { %1185 = vmatpush.msra.mxu0 %v2419_v63  ;;  %1205 = vmatpush.msra.mxu1 %v1599_v31 }
 0x323   :  { %1104 = vmatpush.msrb.mxu3 %v2502_v32 }
 0x324   :  { %1186 = vmatpush.msra.mxu0 %v2424_v37  ;;  %1206 = vmatpush.msra.mxu1 %v1601_v35 }
 0x381   :  { %v842_v36 = vpop.f32.mrf.mxu0 }
 0x382   :  { %v889_v38 = vrot.slane %v842_v36, 4  ;;  %v862_v37 = vpop.f32.mrf.mxu1 }
 0x383   :  { %v911_v0 = vadd.f32 %v862_v37, %v2633_v44 }
 0x384   :  { %v891_v42 = vadd.f32 %v889_v38, %v2632_v23 }
 0x385   :  { %v913_v47 = vrot.slane %v911_v0, 4 }
 0x386   :  { %v1435_v51 = vmul.f32 -1.442695, %v891_v42 }
 0x387   :  { %v822_v58 = vpop.f32.mrf.mxu3 }
 0x388   :  { %1510 = vpow2.f32 %v1435_v51  ;;  %v866_v50 = vrot.slane %v822_v58, 4  ;;  %v2540_v58 = vld [vmem:[%s2576_s5] sm:$0x1] }
 0x38a   :  { %v868_v60 = vadd.f32 %v866_v50, %v2631_v16 }
 0x38c   :  { %v1434_v56 = vmul.f32 -1.442695, %v868_v60 }
 0x38e   :  { %v1511_v39 = vpop.eup %1510  ;;  %1512 = vpow2.f32 %v1434_v56 }
 0x38f   :  { %v895_v59 = vadd.f32 1.0, %v1511_v39 }
 0x391   :  { %1514 = vrcp.f32 %v895_v59  ;;  %v907_v57 = vand.u32 2147483648, %v895_v59  ;;  %vm901_vm1 = vweird.f32 %v895_v59  ;;  %v905_v45 = vand.u32 2147483647, %v895_v59 }
 0x393   :  { %v908_v49 = vor.u32 1.1754944e-38, %v907_v57  ;;  %vm906_vm15 = vcmp.eq.f32.partialorder %v905_v45, 8.507059e+37 }
 0x394   :  { %v1513_v48 = vpop.eup %1512 }
 0x395   :  { %v872_v2 = vadd.f32 1.0, %v1513_v48 }
 0x397   :  { %1516 = vrcp.f32 %v872_v2  ;;  %v1515_v52 = vpop.eup %1514  ;;  %v884_v41 = vand.u32 2147483648, %v872_v2  ;;  %v882_v3 = vand.u32 2147483647, %v872_v2  ;;  %vm878_vm11 = vweird.f32 %v872_v2 }
 0x398   :  { %v897_v13 = vmul.f32 %v1515_v52, %v895_v59  ;;  %vm902_vm0 = vweird.f32 %v1515_v52 }
 0x399   :  { %v885_v29 = vor.u32 1.1754944e-38, %v884_v41  ;;  %vm883_vm13 = vcmp.eq.f32.partialorder %v882_v3, 8.507059e+37  ;;  %vm903_vm14 = vmor %vm901_vm1, %vm902_vm0 }
 0x39a   :  { %v898_v63 = vsub.f32 1.0, %v897_v13 }
 0x39c   :  { %v899_v5 = vmul.f32 %v1515_v52, %v898_v63 }
 0x39d   :  { %v1517_v40 = vpop.eup %1516 }
 0x39e   :  { %v874_v21 = vmul.f32 %v1517_v40, %v872_v2  ;;  %vm879_vm2 = vweird.f32 %v1517_v40  ;;  %v900_v33 = vadd.f32 %v1515_v52, %v899_v5 }
 0x39f   :  { %vm880_vm12 = vmor %vm878_vm11, %vm879_vm2 }
 0x3a0   :  { %v875_v11 = vsub.f32 1.0, %v874_v21  ;;  %v904_v61 = vsel %vm903_vm14, %v1515_v52, %v900_v33 }
 0x3a1   :  { %v909_v55 = vsel %vm906_vm15, %v908_v49, %v904_v61 }
 0x3a2   :  { %v876_v15 = vmul.f32 %v1517_v40, %v875_v11  ;;  %v918_v46 = vsub.f32 1.0, %v909_v55  ;;  %v922_v31 = vmul.f32 %v920_v53, %v909_v55 }
 0x3a4   :  { %v877_v54 = vadd.f32 %v1517_v40, %v876_v15 }
 0x3a6   :  { %v881_v8 = vsel %vm880_vm12, %v1517_v40, %v877_v54 }
 0x3a7   :  { %v886_v9 = vsel %vm883_vm13, %v885_v29, %v881_v8 }
 0x3a8   :  { %v915_v62 = vmul.f32 %v913_v47, %v886_v9 }
 0x3aa   :  { %v916_v44 = vadd.f32 %v915_v62, %v2183_v4 }
 0x3ac   :  { %1518 = vtanh.f32 %v916_v44 }
 0x3b2   :  { %v1519_v10 = vpop.eup %1518 }
 0x3b3   :  { %v919_v27 = vmul.f32 %v1519_v10, %v918_v46 }
 0x3b5   :  { %v2511_v35 = vadd.f32 %v922_v31, %v919_v27 }
 0x3b7   :  { %v925_v36 = vrot.slane %v2511_v35, 4  ;;  %v2517_v38 = vsel %vm189_vm3, %v2439_v19, %v2511_v35  ;;  %v1042_v5 = vrot.slane %v2511_v35, 7 }
 0x3b9   :  { %943 = vmatmul.f32.vlgmr.msra.gmra.mxu2 %v925_v36  ;;  %963 = vmatmul.f32.vlgmr.msra.gmra.mxu3 %v925_v36 }
 0x3ba   :  { %983 = vmatmul.f32.vlgmr.msrb.gmra.mxu0 %v925_v36  ;;  %1211 = vmatpush.msra.mxu2 %v2310_v14 }
 0x3bc   :  { %1212 = vmatpush.msra.mxu2 %v2319_v43 }
 0x3be   :  { %1213 = vmatpush.msra.mxu2 %v2328_v22 }
 0x3c0   :  { %1214 = vmatpush.msra.mxu2 %v2337_v26 }
 0x3c2   :  { %1215 = vmatpush.msra.mxu2 %v2346_v30 }
 0x3c4   :  { %1216 = vmatpush.msra.mxu2 %v2355_v34 }
 0x3c6   :  { %1217 = vmatpush.msra.mxu2 %v2459_v1 }
 0x3c8   :  { %1218 = vmatpush.msra.mxu2 %v2464_v12 }
 0x3ca   :  { %1219 = vmatpush.msra.mxu2 %v2469_v17 }
 0x3cc   :  { %1220 = vmatpush.msra.mxu2 %v2474_v18 }
 0x3ce   :  { %1221 = vmatpush.msra.mxu2 %v2479_v6 }
 0x3d0   :  { %1222 = vmatpush.msra.mxu2 %v2484_v20 }
 0x3d2   :  { %1223 = vmatpush.msra.mxu2 %v2489_v24 }
 0x3d4   :  { %1224 = vmatpush.msra.mxu2 %v2494_v25 }
 0x3d6   :  { %1225 = vmatpush.msra.mxu2 %v2498_v28 }
 0x3d8   :  { %1226 = vmatpush.msra.mxu2 %v2502_v32 }
 0x437   :  { %v984_v25 = vpop.f32.mrf.mxu0 }
 0x438   :  { %v1033_v50 = vadd.f32 %v2540_v58, %v984_v25 }
 0x43a   :  { %v1035_v2 = vrot.slane %v1033_v50, 3 }
 0x43c   :  { %v944_v14 = vpop.f32.mrf.mxu2  ;;  %v964_v43 = vpop.f32.mrf.mxu3 }
 0x43d   :  { %v988_v22 = vrot.slane %v944_v14, 3  ;;  %v1011_v26 = vrot.slane %v964_v43, 3 }
 0x43f   :  { %v990_v30 = vadd.f32 %v988_v22, %v2631_v16  ;;  %v1013_v34 = vadd.f32 %v1011_v26, %v2632_v23 }
 0x441   :  { %v1436_v7 = vmul.f32 -1.442695, %v990_v30  ;;  %v1437_v19 = vmul.f32 -1.442695, %v1013_v34 }
 0x443   :  { %1520 = vpow2.f32 %v1436_v7 }
 0x444   :  { %1522 = vpow2.f32 %v1437_v19 }
 0x449   :  { %v1521_v1 = vpop.eup %1520 }
 0x44a   :  { %v1523_v12 = vpop.eup %1522  ;;  %v994_v17 = vadd.f32 1.0, %v1521_v1 }
 0x44b   :  { %v1017_v18 = vadd.f32 1.0, %v1523_v12 }
 0x44c   :  { %1524 = vrcp.f32 %v994_v17  ;;  %v1006_v42 = vand.u32 2147483648, %v994_v17  ;;  %v1004_v56 = vand.u32 2147483647, %v994_v17  ;;  %vm1000_vm7 = vweird.f32 %v994_v17 }
 0x44d   :  { %1526 = vrcp.f32 %v1017_v18  ;;  %v1029_v63 = vand.u32 2147483648, %v1017_v18  ;;  %vm1023_vm2 = vweird.f32 %v1017_v18  ;;  %v1027_v37 = vand.u32 2147483647, %v1017_v18 }
 0x44e   :  { %v1007_v48 = vor.u32 1.1754944e-38, %v1006_v42  ;;  %vm1005_vm9 = vcmp.eq.f32.partialorder %v1004_v56, 8.507059e+37 }
 0x44f   :  { %v1030_v0 = vor.u32 1.1754944e-38, %v1029_v63  ;;  %vm1028_vm12 = vcmp.eq.f32.partialorder %v1027_v37, 8.507059e+37  ;;  %v1311_v63 = vld [vmem:[#allocation10 + $0x70] sm:$0xff]  ;;  %v1310_v37 = vld [vmem:[#allocation10 + $0x68] sm:$0xff] }
 0x452   :  { %v1525_v6 = vpop.eup %1524 }
 0x453   :  { %v1527_v20 = vpop.eup %1526  ;;  %v996_v24 = vmul.f32 %v1525_v6, %v994_v17  ;;  %vm1001_vm3 = vweird.f32 %v1525_v6 }
 0x454   :  { %v1019_v28 = vmul.f32 %v1527_v20, %v1017_v18  ;;  %vm1002_vm8 = vmor %vm1000_vm7, %vm1001_vm3  ;;  %vm1024_vm10 = vweird.f32 %v1527_v20 }
 0x455   :  { %v997_v32 = vsub.f32 1.0, %v996_v24  ;;  %vm1025_vm11 = vmor %vm1023_vm2, %vm1024_vm10 }
 0x456   :  { %v1020_v51 = vsub.f32 1.0, %v1019_v28 }
 0x457   :  { %v998_v60 = vmul.f32 %v1525_v6, %v997_v32 }
 0x458   :  { %v1021_v39 = vmul.f32 %v1527_v20, %v1020_v51 }
 0x459   :  { %v999_v59 = vadd.f32 %v1525_v6, %v998_v60 }
 0x45a   :  { %v1022_v40 = vadd.f32 %v1527_v20, %v1021_v39 }
 0x45b   :  { %v1003_v52 = vsel %vm1002_vm8, %v1525_v6, %v999_v59 }
 0x45c   :  { %v1008_v13 = vsel %vm1005_vm9, %v1007_v48, %v1003_v52  ;;  %v1026_v41 = vsel %vm1025_vm11, %v1527_v20, %v1022_v40 }
 0x45d   :  { %v1037_v21 = vmul.f32 %v1035_v2, %v1008_v13  ;;  %v1031_v15 = vsel %vm1028_vm12, %v1030_v0, %v1026_v41  ;;  %v1308_v41 = vld [vmem:[#allocation10 + $0x58] sm:$0xff] }
 0x45e   :  { %v1040_v3 = vsub.f32 1.0, %v1031_v15  ;;  %v1044_v47 = vmul.f32 %v1042_v5, %v1031_v15 }
 0x45f   :  { %v1038_v11 = vadd.f32 %v1037_v21, %v2183_v4  ;;  %v1312_v21 = vld [vmem:[#allocation10 + $0x78] sm:$0xff] }
 0x460   :  { %1317 = vmatpush.msra.mxu3 %v1312_v21 }
 0x461   :  { %1528 = vtanh.f32 %v1038_v11  ;;  %v1309_v11 = vld [vmem:[#allocation10 + $0x60] sm:$0xff] }
 0x462   :  { %1318 = vmatpush.msra.mxu3 %v1311_v63 }
 0x464   :  { %1319 = vmatpush.msra.mxu3 %v1310_v37 }
 0x466   :  { %1320 = vmatpush.msra.mxu3 %v1309_v11 }
 0x467   :  { %v1529_v54 = vpop.eup %1528 }
 0x468   :  { %v1041_v29 = vmul.f32 %v1529_v54, %v1040_v3  ;;  %1321 = vmatpush.msra.mxu3 %v1308_v41  ;;  %v1307_v3 = vld [vmem:[#allocation10 + $0x50] sm:$0xff] }
 0x46a   :  { %v1045_v8 = vadd.f32 %v1044_v47, %v1041_v29  ;;  %1322 = vmatpush.msra.mxu3 %v1307_v3  ;;  %v1306_v29 = vld [vmem:[#allocation10 + $0x48] sm:$0xff] }
 0x46c   :  { %v1047_v9 = vrot.slane %v1045_v8, 5  ;;  %v1294_v33 = vsel %vm191_vm4, %v2517_v38, %v1045_v8  ;;  %v1164_v39 = vrot.slane %v1045_v8, 7  ;;  %1323 = vmatpush.msra.mxu3 %v1306_v29 }
 0x46e   :  { %1065 = vmatmul.f32.vlgmr.msrb.gmra.mxu1 %v1047_v9  ;;  %1085 = vmatmul.f32.vlgmr.msrb.gmra.mxu2 %v1047_v9 }
 0x46f   :  { %1105 = vmatmul.f32.vlgmr.msrb.gmra.mxu3 %v1047_v9  ;;  %v1305_v9 = vld [vmem:[#allocation10 + $0x40] sm:$0xff] }
 0x470   :  { %1324 = vmatpush.msra.mxu3 %v1305_v9 }
 0x4eb   :  { %v1066_v57 = vpop.f32.mrf.mxu1 }
 0x4ec   :  { %v1110_v62 = vrot.slane %v1066_v57, 2 }
 0x4ee   :  { %v1112_v45 = vadd.f32 %v1110_v62, %v2631_v16  ;;  %v1304_v62 = vld [vmem:[#allocation10 + $0x38] sm:$0xff] }
 0x4ef   :  { %1325 = vmatpush.msra.mxu3 %v1304_v62 }
 0x4f0   :  { %v1438_v44 = vmul.f32 -1.442695, %v1112_v45  ;;  %v1303_v45 = vld [vmem:[#allocation10 + $0x30] sm:$0xff] }
 0x4f1   :  { %v1086_v61 = vpop.f32.mrf.mxu2  ;;  %1326 = vmatpush.msra.mxu3 %v1303_v45 }
 0x4f2   :  { %1530 = vpow2.f32 %v1438_v44  ;;  %v1133_v49 = vrot.slane %v1086_v61, 2  ;;  %v1106_v38 = vpop.f32.mrf.mxu3  ;;  %v1302_v44 = vld [vmem:[#allocation10 + $0x28] sm:$0xff]  ;;  %v1301_v61 = vld [vmem:[#allocation10 + $0x20] sm:$0xff] }
 0x4f3   :  { %v1155_v30 = vadd.f32 %v2540_v58, %v1106_v38  ;;  %1327 = vmatpush.msra.mxu3 %v1302_v44 }
 0x4f4   :  { %v1135_v55 = vadd.f32 %v1133_v49, %v2632_v23  ;;  %v1300_v49 = vld [vmem:[#allocation10 + $0x18] sm:$0xff] }
 0x4f5   :  { %v1157_v18 = vrot.slane %v1155_v30, 2  ;;  %1328 = vmatpush.msra.mxu3 %v1301_v61 }
 0x4f6   :  { %v1439_v46 = vmul.f32 -1.442695, %v1135_v55 }
 0x4f7   :  { %1329 = vmatpush.msra.mxu3 %v1300_v49 }
 0x4f8   :  { %v1531_v53 = vpop.eup %1530  ;;  %1532 = vpow2.f32 %v1439_v46 }
 0x4f9   :  { %v1116_v10 = vadd.f32 1.0, %v1531_v53 }
 0x4fb   :  { %1534 = vrcp.f32 %v1116_v10  ;;  %v1128_v43 = vand.u32 2147483648, %v1116_v10  ;;  %v1126_v26 = vand.u32 2147483647, %v1116_v10  ;;  %vm1122_vm13 = vweird.f32 %v1116_v10 }
 0x4fd   :  { %v1129_v1 = vor.u32 1.1754944e-38, %v1128_v43  ;;  %vm1127_vm1 = vcmp.eq.f32.partialorder %v1126_v26, 8.507059e+37 }
 0x4fe   :  { %v1533_v27 = vpop.eup %1532 }
 0x4ff   :  { %v1139_v31 = vadd.f32 1.0, %v1533_v27  ;;  %v1297_v27 = vld [vmem:[#allocation10] sm:$0xff] }
 0x501   :  { %v1535_v35 = vpop.eup %1534  ;;  %1536 = vrcp.f32 %v1139_v31  ;;  %v1151_v24 = vand.u32 2147483648, %v1139_v31  ;;  %v1149_v28 = vand.u32 2147483647, %v1139_v31  ;;  %vm1145_vm15 = vweird.f32 %v1139_v31 }
 0x502   :  { %v1118_v36 = vmul.f32 %v1535_v35, %v1116_v10  ;;  %vm1123_vm4 = vweird.f32 %v1535_v35  ;;  %v1298_v10 = vld [vmem:[#allocation10 + $0x8] sm:$0xff] }
 0x503   :  { %vm1124_vm0 = vmor %vm1122_vm13, %vm1123_vm4  ;;  %v1152_v51 = vor.u32 1.1754944e-38, %v1151_v24  ;;  %vm1150_vm7 = vcmp.eq.f32.partialorder %v1149_v28, 8.507059e+37 }
 0x504   :  { %v1119_v14 = vsub.f32 1.0, %v1118_v36 }
 0x506   :  { %v1120_v22 = vmul.f32 %v1535_v35, %v1119_v14 }
 0x507   :  { %v1537_v34 = vpop.eup %1536 }
 0x508   :  { %v1141_v7 = vmul.f32 %v1537_v34, %v1139_v31  ;;  %v1121_v19 = vadd.f32 %v1535_v35, %v1120_v22  ;;  %vm1146_vm14 = vweird.f32 %v1537_v34 }
 0x509   :  { %vm1147_vm3 = vmor %vm1145_vm15, %vm1146_vm14 }
 0x50a   :  { %v1142_v12 = vsub.f32 1.0, %v1141_v7  ;;  %v1125_v17 = vsel %vm1124_vm0, %v1535_v35, %v1121_v19 }
 0x50b   :  { %v1130_v6 = vsel %vm1127_vm1, %v1129_v1, %v1125_v17 }
 0x50c   :  { %v1143_v20 = vmul.f32 %v1537_v34, %v1142_v12  ;;  %v1159_v25 = vmul.f32 %v1157_v18, %v1130_v6 }
 0x50e   :  { %v1144_v32 = vadd.f32 %v1537_v34, %v1143_v20  ;;  %v1160_v42 = vadd.f32 %v1159_v25, %v2183_v4 }
 0x510   :  { %v1148_v50 = vsel %vm1147_vm3, %v1537_v34, %v1144_v32  ;;  %1538 = vtanh.f32 %v1160_v42 }
 0x511   :  { %v1153_v60 = vsel %vm1150_vm7, %v1152_v51, %v1148_v50 }
 0x512   :  { %v1162_v56 = vsub.f32 1.0, %v1153_v60  ;;  %v1166_v2 = vmul.f32 %v1164_v39, %v1153_v60 }
 0x516   :  { %v1539_v59 = vpop.eup %1538 }
 0x517   :  { %v1163_v48 = vmul.f32 %v1539_v59, %v1162_v56 }
 0x519   :  { %v2551_v52 = vadd.f32 %v1166_v2, %v1163_v48 }
 0x51b   :  { %v1169_v13 = vrot.slane %v2551_v52, 6  ;;  %v2556_v40 = vsel %vm193_vm5, %v1294_v33, %v2551_v52  ;;  %v1286_v60 = vrot.slane %v2551_v52, 7 }
 0x51d   :  { %1187 = vmatmul.f32.vlgmr.msra.gmra.mxu0 %v1169_v13  ;;  %1207 = vmatmul.f32.vlgmr.msra.gmra.mxu1 %v1169_v13 }
 0x51e   :  { %1227 = vmatmul.f32.vlgmr.msra.gmra.mxu2 %v1169_v13 }
 0x59a   :  { %v1188_v0 = vpop.f32.mrf.mxu0  ;;  %v1208_v15 = vpop.f32.mrf.mxu1 }
 0x59b   :  { %v1232_v5 = vrot.slane %v1188_v0, 1  ;;  %v1255_v54 = vrot.slane %v1208_v15, 1 }
 0x59d   :  { %v1234_v47 = vadd.f32 %v1232_v5, %v2631_v16  ;;  %v1257_v8 = vadd.f32 %v1255_v54, %v2632_v23  ;;  %v1299_v23 = vld [vmem:[#allocation10 + $0x10] sm:$0xff] }
 0x59e   :  { %1330 = vmatpush.msra.mxu3 %v1299_v23 }
 0x59f   :  { %v1440_v33 = vmul.f32 -1.442695, %v1234_v47  ;;  %v1441_v57 = vmul.f32 -1.442695, %v1257_v8 }
 0x5a0   :  { %1331 = vmatpush.msra.mxu3 %v1298_v10 }
 0x5a1   :  { %1540 = vpow2.f32 %v1440_v33  ;;  %v1228_v14 = vpop.f32.mrf.mxu2 }
 0x5a2   :  { %1542 = vpow2.f32 %v1441_v57  ;;  %1332 = vmatpush.msra.mxu3 %v1297_v27  ;;  %v1277_v7 = vadd.f32 %v2540_v58, %v1228_v14 }
 0x5a4   :  { %v1279_v18 = vrot.slane %v1277_v7, 1 }
 0x5a7   :  { %v1541_v55 = vpop.eup %1540 }
 0x5a8   :  { %v1543_v16 = vpop.eup %1542  ;;  %v1238_v46 = vadd.f32 1.0, %v1541_v55 }
 0x5a9   :  { %v1261_v53 = vadd.f32 1.0, %v1543_v16 }
 0x5aa   :  { %1544 = vrcp.f32 %v1238_v46  ;;  %v1250_v26 = vand.u32 2147483648, %v1238_v46  ;;  %v1248_v34 = vand.u32 2147483647, %v1238_v46  ;;  %vm1244_vm8 = vweird.f32 %v1238_v46 }
 0x5ab   :  { %1546 = vrcp.f32 %v1261_v53  ;;  %v1273_v25 = vand.u32 2147483648, %v1261_v53  ;;  %vm1267_vm11 = vweird.f32 %v1261_v53  ;;  %v1271_v28 = vand.u32 2147483647, %v1261_v53 }
 0x5ac   :  { %v1251_v12 = vor.u32 1.1754944e-38, %v1250_v26  ;;  %vm1249_vm10 = vcmp.eq.f32.partialorder %v1248_v34, 8.507059e+37 }
 0x5ad   :  { %v1274_v58 = vor.u32 1.1754944e-38, %v1273_v25  ;;  %vm1272_vm4 = vcmp.eq.f32.partialorder %v1271_v28, 8.507059e+37 }
 0x5b0   :  { %v1545_v31 = vpop.eup %1544 }
 0x5b1   :  { %v1547_v35 = vpop.eup %1546  ;;  %v1240_v36 = vmul.f32 %v1545_v31, %v1238_v46  ;;  %vm1245_vm5 = vweird.f32 %v1545_v31 }
 0x5b2   :  { %v1263_v38 = vmul.f32 %v1547_v35, %v1261_v53  ;;  %vm1246_vm9 = vmor %vm1244_vm8, %vm1245_vm5  ;;  %vm1268_vm2 = vweird.f32 %v1547_v35 }
 0x5b3   :  { %v1241_v43 = vsub.f32 1.0, %v1240_v36  ;;  %vm1269_vm12 = vmor %vm1267_vm11, %vm1268_vm2 }
 0x5b4   :  { %v1264_v22 = vsub.f32 1.0, %v1263_v38 }
 0x5b5   :  { %v1242_v30 = vmul.f32 %v1545_v31, %v1241_v43 }
 0x5b6   :  { %v1265_v19 = vmul.f32 %v1547_v35, %v1264_v22 }
 0x5b7   :  { %v1243_v1 = vadd.f32 %v1545_v31, %v1242_v30 }
 0x5b8   :  { %v1266_v20 = vadd.f32 %v1547_v35, %v1265_v19 }
 0x5b9   :  { %v1247_v17 = vsel %vm1246_vm9, %v1545_v31, %v1243_v1 }
 0x5ba   :  { %v1252_v6 = vsel %vm1249_vm10, %v1251_v12, %v1247_v17  ;;  %v1270_v42 = vsel %vm1269_vm12, %v1547_v35, %v1266_v20 }
 0x5bb   :  { %v1281_v24 = vmul.f32 %v1279_v18, %v1252_v6  ;;  %v1275_v51 = vsel %vm1272_vm4, %v1274_v58, %v1270_v42 }
 0x5bc   :  { %v1284_v50 = vsub.f32 1.0, %v1275_v51  ;;  %v1288_v59 = vmul.f32 %v1286_v60, %v1275_v51 }
 0x5bd   :  { %v1282_v32 = vadd.f32 %v1281_v24, %v2183_v4  ;;  %v1469_v4 = vld [vmem:[%s2578_s7] ss:$0 sm:$0xff] }
 0x5bf   :  { %1548 = vtanh.f32 %v1282_v32 }
 0x5c5   :  { %v1549_v56 = vpop.eup %1548 }
 0x5c6   :  { %v1285_v39 = vmul.f32 %v1549_v56, %v1284_v50 }
 0x5c8   :  { %v1289_v48 = vadd.f32 %v1288_v59, %v1285_v39 }
 0x5ca   :  { %v1296_v2 = vsel %vm195_vm6, %v2556_v40, %v1289_v48 }
 0x5cb   :  { %1333 = vmatmul.f32.vlgmr.msra.gmra.mxu3 %v1296_v2 }
 0x64e   :  { %v1334_v13 = vpop.f32.mrf.mxu3 }
 0x64f   :  { %v1335_v21 = vadd.f32 %v1469_v4, %v1334_v13 }
 0x651   :  { %1337 = vmax.xlane.f32.xlu0 %v1335_v21 }
 0x6c4   :  { %v1338_v63 = vpop.xlane.xlu0 %1337 }
 0x6c5   :  { %v1339_v37 = vsub.f32 %v1335_v21, %v1338_v63 }
 0x6c7   :  { %v1340_v11 = vmul.f32 1.442695, %v1339_v37 }
 0x6c9   :  { %1550 = vpow2.f32 %v1340_v11 }
 0x6cf   :  { %v1551_v52 = vpop.eup %1550 }
 0x6d0   :  { %1342 = vadd.xlane.f32.xlu0 %v1551_v52 }
 0x743   :  { %v1343_v41 = vpop.xlane.xlu0 %1342 }
 0x744   :  { %1552 = vlog2.f32 %v1343_v41 }
 0x74a   :  { %v1553_v0 = vpop.eup %1552 }
 0x74b   :  { %v1345_v40 = vmul.f32 0.6931472, %v1553_v0 }
 0x74d   :  { %v1346_v15 = vsub.f32 %v1339_v37, %v1345_v40 }
 0x74f   :  { %1347 = vst [vmem:[#allocation12] sm:$0xff] %v1346_v15 }
 0x750   :  { %1358 = dma.vmem_to_hbm [thread:$0]  %s1354_s10, 128, %s1356_s13, [#allocation4]  }
 0x751   :  { %1743 = dma.done.wait [#allocation4], 128  }
 0x752   :  { %1744 = vsyncadd [#allocation4], 4294967168 }
 0x753   :  { %1363 = vsyncpa [#allocation3], 1 }
 0x754   :  { %1364 = vsyncpa [#allocation8], 1 }
 0x755   :  { %1365 = vsyncpa [#allocation11], 1 }
 0x756   :  { %1366 = vsyncpa [#allocation4], 1 }
 0x757   :  { %1367 = vsyncpa [#allocation5], 1 }

</bundles_post_ra>
